<compile_context>
chip_gen: v7x
topology: tpu7x:2x2x1
jax: 0.10.0
libtpu: 0.0.40
codegen_flags: <defaults>
</compile_context>

<pallas_src>
import math
import functools

import jax
import jax.numpy as jnp
from jax.experimental import pallas as pl
from jax.experimental.pallas import tpu as pltpu


def _mhsa_kernel(x_ref, wqkv_ref, bqkv_ref, mask_ref, o_ref, kh_ref, vh_ref, *,
                 n_heads, q_tile):
    # x_ref:    (1, S, D)   bf16, current batch element (full sequence, for K/V)
    # wqkv_ref: (D, 3D)     fused [Wq | Wk | Wv], bf16
    # bqkv_ref: (1, 3D)     fused [bq | bk | bv], f32
    # mask_ref: (1, 1, S)   f32, 1.0 = keep / 0.0 = masked
    # o_ref:    (1, TQ, D)  current query tile of the output, f32
    # kh_ref:   (H, S, W)   bf16 VMEM scratch — K cached across query tiles
    # vh_ref:   (H, S, W)   bf16 VMEM scratch — V cached across query tiles
    S = x_ref.shape[1]
    D = x_ref.shape[2]
    H = n_heads
    W = D // H
    TQ = q_tile
    inv_sqrt_w = 1.0 / math.sqrt(W)

    qi = pl.program_id(1)

    # ---- Project K/V for the whole sequence ONCE per batch element; qi > 0 reuses.
    @pl.when(qi == 0)
    def _project_kv():
        x = x_ref[0]                                                        # (S, D) bf16
        kv = jnp.dot(x, wqkv_ref[:, D:],
                     preferred_element_type=jnp.float32) + bqkv_ref[:, D:]  # (S, 2D) f32
        k = kv[:, :D].astype(jnp.bfloat16)
        v = kv[:, D:].astype(jnp.bfloat16)
        kh_ref[...] = k.reshape(S, H, W).transpose(1, 0, 2)                 # (H, S, W)
        vh_ref[...] = v.reshape(S, H, W).transpose(1, 0, 2)                 # (H, S, W)

    # ---- Q projection for this tile; 1/sqrt(W) folded into q (TQ*D mul, not H*TQ*S).
    q_start = pl.multiple_of(qi * TQ, TQ)
    xq = x_ref[0, pl.ds(q_start, TQ), :]                                    # (TQ, D) bf16
    q = (jnp.dot(xq, wqkv_ref[:, :D], preferred_element_type=jnp.float32)
         + bqkv_ref[:, :D]) * inv_sqrt_w                                    # (TQ, D) f32
    qh = q.astype(jnp.bfloat16).reshape(TQ, H, W).transpose(1, 0, 2)        # (H, TQ, W)

    # ---- Head-batched QK^T (contraction over W; no explicit K transpose feeds MXU).
    scores = jnp.einsum("hqw,hkw->hqk", qh, kh_ref[...],
                        preferred_element_type=jnp.float32)                 # (H, TQ, S)

    # Additive mask (matches BERT reference: -10000, not -inf; a fully-masked row
    # therefore softmaxes to near-uniform, same as the torch module).
    neg_bias = 10000.0 * (1.0 - mask_ref[0])                                # (1, S)
    scores = scores - neg_bias[None, :, :]                                  # (H, TQ, S)

    # Numerically-stable softmax over keys, kept in f32 (v5e has no bf16 VPU/EUP).
    # approx reciprocal is fine for inference; use exact for training-grade accuracy.
    m = jnp.max(scores, axis=-1, keepdims=True)
    e = jnp.exp(scores - m)
    p = e * pl.reciprocal(jnp.sum(e, axis=-1, keepdims=True), approx=True)

    # TODO(synk): attention dropout (p_drop_attn) is identity at inference; skipped.

    # ---- Head-batched PV, merge heads, ONE lane-dense (TQ, D) store.
    ctx = jnp.einsum("hqk,hkw->hqw", p.astype(jnp.bfloat16), vh_ref[...],
                     preferred_element_type=jnp.float32)                    # (H, TQ, W)
    o_ref[0] = ctx.transpose(1, 0, 2).reshape(TQ, D).astype(o_ref.dtype)


def _pick_q_tile(seq_len, q_tile):
    """Largest sublane-aligned divisor of seq_len that is <= q_tile."""
    if seq_len <= q_tile:
        return seq_len
    for t in range(q_tile, 7, -1):
        if seq_len % t == 0 and t % 8 == 0:
            return t
    # No aligned divisor found; fall back to the full sequence (VMEM-heavy if large).
    return seq_len


def _vmem_limit_bytes(S, D, H, TQ):
    bf16, f32 = 2, 4
    est = (
        2 * S * D * bf16                # x block, double-buffered, bf16
        + 3 * D * D * bf16              # fused Wqkv, single-buffered
        + 3 * D * f32 + 2 * S * f32     # bias + mask
        + 2 * TQ * D * f32              # output block, double-buffered
        + 2 * S * D * bf16              # K/V head-major caches (VMEM scratch)
        + 4 * H * TQ * S * f32          # scores / exp / temporaries
        + H * TQ * S * bf16             # p in bf16
        + 2 * S * 2 * D * f32           # K/V projection intermediate (qi == 0)
        + 4 * TQ * D * f32              # q / qh / ctx
    )
    # >= 32 MiB is safe on all generations; <= 56 MiB fits v7x's 64 MiB physical VMEM.
    return int(max(32 * 1024 * 1024, min(2 * est, 56 * 1024 * 1024)))


def _build_call(B, S, D, H, TQ, n_q, single_buffer_weights):
    kernel = functools.partial(_mhsa_kernel, n_heads=H, q_tile=TQ)
    const_kw = dict(pipeline_mode=pl.Buffered(1)) if single_buffer_weights else {}
    return pl.pallas_call(
        kernel,
        out_shape=jax.ShapeDtypeStruct((B, S, D), jnp.float32),
        grid_spec=pltpu.PrefetchScalarGridSpec(
            num_scalar_prefetch=0,
            grid=(B, n_q),                                            # qi innermost
            in_specs=[
                pl.BlockSpec((1, S, D), lambda b, qi: (b, 0, 0)),     # x (bf16, full seq)
                pl.BlockSpec((D, 3 * D), lambda b, qi: (0, 0), **const_kw),   # fused Wqkv
                pl.BlockSpec((1, 3 * D), lambda b, qi: (0, 0), **const_kw),   # fused bias
                pl.BlockSpec((1, 1, S), lambda b, qi: (b, 0, 0)),     # mask
            ],
            out_specs=pl.BlockSpec((1, TQ, D), lambda b, qi: (b, qi, 0)),
            scratch_shapes=[
                pltpu.VMEM((H, S, D // H), jnp.bfloat16),             # cached K
                pltpu.VMEM((H, S, D // H), jnp.bfloat16),             # cached V
            ],
        ),
        compiler_params=pltpu.CompilerParams(
            # Batch axis parallel (megacore); qi must be sequential for the K/V carry.
            dimension_semantics=("parallel", "arbitrary"),
            vmem_limit_bytes=_vmem_limit_bytes(S, D, H, TQ),
        ),
    )


def multi_headed_self_attention(x, mask, wq, bq, wk, bk, wv, bv, n_heads, *,
                                q_tile=256):
    """x: (B, S, D) f32, mask: (B, S) f32 (1.0 = keep, 0.0 = masked)."""
    B, S, D = x.shape
    H = n_heads
    assert D % H == 0, "dim must be divisible by n_heads"

    TQ = _pick_q_tile(S, q_tile)
    n_q = S // TQ

    # bf16 streaming operands: halves the dominant HBM traffic / pipeline buffers and
    # matches the MXU input precision (accumulation stays f32 inside the kernel).
    x_bf16 = x.astype(jnp.bfloat16)
    wqkv = jnp.concatenate([wq, wk, wv], axis=1).astype(jnp.bfloat16)       # (D, 3D)
    bqkv = jnp.concatenate([bq, bk, bv]).reshape(1, 3 * D).astype(jnp.float32)
    mask3 = mask.reshape(B, 1, S).astype(jnp.float32)

    args = (x_bf16, wqkv, bqkv, mask3)
    try:
        return _build_call(B, S, D, H, TQ, n_q, single_buffer_weights=True)(*args)
    except Exception:
        # Fallback for runtimes that reject pipeline_mode on pallas_call BlockSpecs.
        return _build_call(B, S, D, H, TQ, n_q, single_buffer_weights=False)(*args)


def _reference(x, mask, wq, bq, wk, bk, wv, bv, n_heads):
    """Pure-JAX f32 reference mirroring the torch forward exactly."""
    B, S, D = x.shape
    W = D // n_heads
    q = x @ wq + bq
    k = x @ wk + bk
    v = x @ wv + bv
    q = q.reshape(B, S, n_heads, W).transpose(0, 2, 1, 3)
    k = k.reshape(B, S, n_heads, W).transpose(0, 2, 1, 3)
    v = v.reshape(B, S, n_heads, W).transpose(0, 2, 1, 3)
    scores = jnp.einsum("bhqw,bhkw->bhqk", q, k) / jnp.sqrt(jnp.float32(W))
    m = mask[:, None, None, :].astype(jnp.float32)
    scores = scores - 10000.0 * (1.0 - m)
    p = jax.nn.softmax(scores, axis=-1)
    h = jnp.einsum("bhqk,bhkw->bhqw", p, v)
    return h.transpose(0, 2, 1, 3).reshape(B, S, D)


def _run_case(key, B, S, D, H, q_tile):
    kx, kq, kk, kv, kbq, kbk, kbv = jax.random.split(key, 7)
    x = jax.random.normal(kx, (B, S, D), dtype=jnp.float32)
    wq = jax.random.normal(kq, (D, D), dtype=jnp.float32) * 0.1
    wk = jax.random.normal(kk, (D, D), dtype=jnp.float32) * 0.1
    wv = jax.random.normal(kv, (D, D), dtype=jnp.float32) * 0.1
    bq = jax.random.normal(kbq, (D,), dtype=jnp.float32) * 0.1
    bk = jax.random.normal(kbk, (D,), dtype=jnp.float32) * 0.1
    bv = jax.random.normal(kbv, (D,), dtype=jnp.float32) * 0.1
    # Binary mask: 1.0 = attend, 0.0 = masked out (last two key positions of batch 1).
    mask = jnp.ones((B, S), dtype=jnp.float32).at[1, -2:].set(0.0)

    out = multi_headed_self_attention(x, mask, wq, bq, wk, bk, wv, bv, H,
                                      q_tile=q_tile)
    out = jax.block_until_ready(out)
    ref = _reference(x, mask, wq, bq, wk, bk, wv, bv, H)
    assert out.shape == (B, S, D)
    # bf16 MXU operands + approximate reciprocal => relaxed tolerance vs f32 reference.
    assert jnp.allclose(out, ref, atol=3e-2, rtol=3e-2), "mismatch vs reference"


if __name__ == "__main__":
    key = jax.random.PRNGKey(0)
    k1, k2 = jax.random.split(key, 2)

    # Small config consistent with the module: dim=32, n_heads=4, seq=8, batch=2.
    # Single query tile (TQ == S): K/V cache built once, n_q == 1.
    _run_case(k1, B=2, S=8, D=32, H=4, q_tile=256)

    # Tiled path: S=16 with q_tile=8 -> 2 query tiles, exercising the K/V cache
    # reuse across the "arbitrary" qi grid axis.
    _run_case(k2, B=2, S=16, D=32, H=4, q_tile=8)

    print("KERNEL_OK")
</pallas_src>

<mosaic_0001>
module attributes {stable_mosaic.version = 11 : i64} {
  func.func @_mhsa_kernel(%arg0: i32, %arg1: i32, %arg2: memref<1x8x32xbf16, #tpu.memory_space<vmem>>, %arg3: memref<32x96xbf16, #tpu.memory_space<vmem>>, %arg4: memref<1x96xf32, #tpu.memory_space<vmem>>, %arg5: memref<1x1x8xf32, #tpu.memory_space<vmem>>, %arg6: memref<1x8x32xf32, #tpu.memory_space<vmem>>, %arg7: memref<4x8x8xbf16, #tpu.memory_space<vmem>>, %arg8: memref<4x8x8xbf16, #tpu.memory_space<vmem>>) attributes {dimension_semantics = [#tpu.dimension_semantics<parallel>, #tpu.dimension_semantics<arbitrary>], iteration_bounds = array<i64: 2, 1>, scalar_prefetch = 0 : i64, scratch_operands = 2 : i64, tpu.core_type = #tpu.core_type<tc>, window_params = [{transform_indices = @transform_0, window_bounds = array<i64: 1, 8, 32>}, {pipeline_mode = #tpu.pipeline_mode<synchronous>, transform_indices = @transform_1, window_bounds = array<i64: 32, 96>}, {pipeline_mode = #tpu.pipeline_mode<synchronous>, transform_indices = @transform_2, window_bounds = array<i64: 1, 96>}, {transform_indices = @transform_3, window_bounds = array<i64: 1, 1, 8>}, {transform_indices = @transform_4, window_bounds = array<i64: 1, 8, 32>}]} {
    %c0_i32 = arith.constant 0 : i32
    %0 = arith.cmpi eq, %arg1, %c0_i32 : i32
    %1 = arith.extui %0 : i1 to i32
    %c0_i32_0 = arith.constant 0 : i32
    %2 = arith.cmpi ne, %1, %c0_i32_0 : i32
    scf.if %2 {
      %c0_25 = arith.constant 0 : index
      %c0_26 = arith.constant 0 : index
      %c0_27 = arith.constant 0 : index
      %47 = vector.load %arg2[%c0_25, %c0_26, %c0_27] : memref<1x8x32xbf16, #tpu.memory_space<vmem>>, vector<1x8x32xbf16>
      %48 = vector.shape_cast %47 : vector<1x8x32xbf16> to vector<8x32xbf16>
      %c0_28 = arith.constant 0 : index
      %c32 = arith.constant 32 : index
      %49 = vector.load %arg3[%c0_28, %c32] : memref<32x96xbf16, #tpu.memory_space<vmem>>, vector<32x64xbf16>
      %cst_29 = arith.constant dense<0.000000e+00> : vector<8x64xf32>
      %50 = tpu.matmul %48, %49, %cst_29 {dimension_numbers = #tpu.dot_dimension_numbers<[1], [0], [0], [1], [0, 0, 1, 1], [], []>} : vector<8x32xbf16>, vector<32x64xbf16>, vector<8x64xf32> -> vector<8x64xf32>
      %c0_30 = arith.constant 0 : index
      %c32_31 = arith.constant 32 : index
      %51 = vector.load %arg4[%c0_30, %c32_31] : memref<1x96xf32, #tpu.memory_space<vmem>>, vector<1x64xf32>
      %52 = vector.broadcast %51 : vector<1x64xf32> to vector<8x64xf32>
      %53 = arith.addf %50, %52 : vector<8x64xf32>
      %54 = vector.extract_strided_slice %53 {offsets = [0, 0], sizes = [8, 32], strides = [1, 1]} : vector<8x64xf32> to vector<8x32xf32>
      %55 = arith.truncf %54 : vector<8x32xf32> to vector<8x32xbf16>
      %56 = vector.extract_strided_slice %53 {offsets = [0, 32], sizes = [8, 32], strides = [1, 1]} : vector<8x64xf32> to vector<8x32xf32>
      %57 = arith.truncf %56 : vector<8x32xf32> to vector<8x32xbf16>
      %58 = vector.shape_cast %55 : vector<8x32xbf16> to vector<8x4x8xbf16>
      %59 = tpu.transpose %58, [1, 0, 2] : vector<8x4x8xbf16> -> vector<4x8x8xbf16>
      %c0_32 = arith.constant 0 : index
      %c0_33 = arith.constant 0 : index
      %c0_34 = arith.constant 0 : index
      %60 = vector.load %arg7[%c0_32, %c0_33, %c0_34] : memref<4x8x8xbf16, #tpu.memory_space<vmem>>, vector<4x8x8xbf16>
      tpu.vector_store %arg7[%c0_32, %c0_33, %c0_34], %59 {strides = array<i32>} : memref<4x8x8xbf16, #tpu.memory_space<vmem>>, vector<4x8x8xbf16>,
      %61 = vector.shape_cast %57 : vector<8x32xbf16> to vector<8x4x8xbf16>
      %62 = tpu.transpose %61, [1, 0, 2] : vector<8x4x8xbf16> -> vector<4x8x8xbf16>
      %c0_35 = arith.constant 0 : index
      %c0_36 = arith.constant 0 : index
      %c0_37 = arith.constant 0 : index
      %63 = vector.load %arg8[%c0_35, %c0_36, %c0_37] : memref<4x8x8xbf16, #tpu.memory_space<vmem>>, vector<4x8x8xbf16>
      tpu.vector_store %arg8[%c0_35, %c0_36, %c0_37], %62 {strides = array<i32>} : memref<4x8x8xbf16, #tpu.memory_space<vmem>>, vector<4x8x8xbf16>,
    } else {
    }
    %c8_i32 = arith.constant 8 : i32
    %3 = arith.muli %arg1, %c8_i32 : i32
    %4 = tpu.assume_multiple %3, 8 : i32
    %c0 = arith.constant 0 : index
    %5 = arith.index_cast %4 : i32 to index
    %c0_1 = arith.constant 0 : index
    %6 = vector.load %arg2[%c0, %5, %c0_1] : memref<1x8x32xbf16, #tpu.memory_space<vmem>>, vector<1x8x32xbf16>
    %7 = vector.shape_cast %6 : vector<1x8x32xbf16> to vector<8x32xbf16>
    %c0_2 = arith.constant 0 : index
    %c0_3 = arith.constant 0 : index
    %8 = vector.load %arg3[%c0_2, %c0_3] : memref<32x96xbf16, #tpu.memory_space<vmem>>, vector<32x32xbf16>
    %cst = arith.constant dense<0.000000e+00> : vector<8x32xf32>
    %9 = tpu.matmul %7, %8, %cst {dimension_numbers = #tpu.dot_dimension_numbers<[1], [0], [0], [1], [0, 0, 1, 1], [], []>} : vector<8x32xbf16>, vector<32x32xbf16>, vector<8x32xf32> -> vector<8x32xf32>
    %c0_4 = arith.constant 0 : index
    %c0_5 = arith.constant 0 : index
    %10 = vector.load %arg4[%c0_4, %c0_5] : memref<1x96xf32, #tpu.memory_space<vmem>>, vector<1x32xf32>
    %11 = vector.broadcast %10 : vector<1x32xf32> to vector<8x32xf32>
    %12 = arith.addf %9, %11 : vector<8x32xf32>
    %cst_6 = arith.constant 0.353553385 : f32
    %13 = vector.broadcast %cst_6 : f32 to vector<8x32xf32>
    %14 = arith.mulf %12, %13 : vector<8x32xf32>
    %15 = arith.truncf %14 : vector<8x32xf32> to vector<8x32xbf16>
    %16 = vector.shape_cast %15 : vector<8x32xbf16> to vector<8x4x8xbf16>
    %17 = tpu.transpose %16, [1, 0, 2] : vector<8x4x8xbf16> -> vector<4x8x8xbf16>
    %c0_7 = arith.constant 0 : index
    %c0_8 = arith.constant 0 : index
    %c0_9 = arith.constant 0 : index
    %18 = vector.load %arg7[%c0_7, %c0_8, %c0_9] : memref<4x8x8xbf16, #tpu.memory_space<vmem>>, vector<4x8x8xbf16>
    "tpu.trace_start"() <{level = 10 : i32, message = "hqw,hkw->hqk"}> : () -> ()
    %cst_10 = arith.constant dense<0.000000e+00> : vector<4x8x8xf32>
    %19 = tpu.matmul %17, %18, %cst_10 {dimension_numbers = #tpu.dot_dimension_numbers<[2], [2], [1], [1], [0, 0, 0, 1, 1, 1], [0], [0]>} : vector<4x8x8xbf16>, vector<4x8x8xbf16>, vector<4x8x8xf32> -> vector<4x8x8xf32>
    "tpu.trace_stop"() : () -> ()
    %c0_11 = arith.constant 0 : index
    %c0_12 = arith.constant 0 : index
    %c0_13 = arith.constant 0 : index
    %20 = vector.load %arg5[%c0_11, %c0_12, %c0_13] : memref<1x1x8xf32, #tpu.memory_space<vmem>>, vector<1x1x8xf32>
    %21 = vector.shape_cast %20 : vector<1x1x8xf32> to vector<1x8xf32>
    %cst_14 = arith.constant 1.000000e+00 : f32
    %22 = vector.broadcast %cst_14 : f32 to vector<1x8xf32>
    %23 = arith.subf %22, %21 : vector<1x8xf32>
    %cst_15 = arith.constant 1.000000e+04 : f32
    %24 = vector.broadcast %cst_15 : f32 to vector<1x8xf32>
    %25 = arith.mulf %24, %23 : vector<1x8xf32>
    %26 = vector.shape_cast %25 : vector<1x8xf32> to vector<1x1x8xf32>
    %27 = vector.broadcast %26 : vector<1x1x8xf32> to vector<4x8x8xf32>
    %28 = arith.subf %19, %27 : vector<4x8x8xf32>
    %cst_16 = arith.constant dense<0xFF800000> : vector<4x8xf32>
    %29 = vector.multi_reduction <maximumf>, %28, %cst_16 [2] : vector<4x8x8xf32> to vector<4x8xf32>
    %30 = vector.shape_cast %29 : vector<4x8xf32> to vector<4x8x1xf32>
    %31 = vector.broadcast %30 : vector<4x8x1xf32> to vector<4x8x8xf32>
    %32 = arith.subf %28, %31 : vector<4x8x8xf32>
    %33 = math.exp %32 : vector<4x8x8xf32>
    %cst_17 = arith.constant dense<0.000000e+00> : vector<4x8xf32>
    %34 = vector.multi_reduction <add>, %33, %cst_17 [2] : vector<4x8x8xf32> to vector<4x8xf32>
    %35 = vector.shape_cast %34 : vector<4x8xf32> to vector<4x8x1xf32>
    %36 = tpu.reciprocal %35 {approx = true} : vector<4x8x1xf32> -> vector<4x8x1xf32>
    %37 = vector.broadcast %36 : vector<4x8x1xf32> to vector<4x8x8xf32>
    %38 = arith.mulf %33, %37 : vector<4x8x8xf32>
    %39 = arith.truncf %38 : vector<4x8x8xf32> to vector<4x8x8xbf16>
    %c0_18 = arith.constant 0 : index
    %c0_19 = arith.constant 0 : index
    %c0_20 = arith.constant 0 : index
    %40 = vector.load %arg8[%c0_18, %c0_19, %c0_20] : memref<4x8x8xbf16, #tpu.memory_space<vmem>>, vector<4x8x8xbf16>
    "tpu.trace_start"() <{level = 10 : i32, message = "hqk,hkw->hqw"}> : () -> ()
    %cst_21 = arith.constant dense<0.000000e+00> : vector<4x8x8xf32>
    %41 = tpu.matmul %39, %40, %cst_21 {dimension_numbers = #tpu.dot_dimension_numbers<[2], [1], [1], [2], [0, 0, 0, 1, 1, 2], [0], [0]>} : vector<4x8x8xbf16>, vector<4x8x8xbf16>, vector<4x8x8xf32> -> vector<4x8x8xf32>
    "tpu.trace_stop"() : () -> ()
    %42 = tpu.transpose %41, [1, 0, 2] : vector<4x8x8xf32> -> vector<8x4x8xf32>
    %43 = vector.shape_cast %42 : vector<8x4x8xf32> to vector<8x32xf32>
    %c0_22 = arith.constant 0 : index
    %c0_23 = arith.constant 0 : index
    %c0_24 = arith.constant 0 : index
    %44 = vector.load %arg6[%c0_22, %c0_23, %c0_24] : memref<1x8x32xf32, #tpu.memory_space<vmem>>, vector<1x8x32xf32>
    %45 = vector.shape_cast %44 : vector<1x8x32xf32> to vector<8x32xf32>
    %46 = vector.shape_cast %43 : vector<8x32xf32> to vector<1x8x32xf32>
    tpu.vector_store %arg6[%c0_22, %c0_23, %c0_24], %46 {strides = array<i32>} : memref<1x8x32xf32, #tpu.memory_space<vmem>>, vector<1x8x32xf32>,
    return
  }
  func.func @transform_0(%arg0: i32, %arg1: i32) -> (i32, i32, i32) {
    %c0_i32 = arith.constant 0 : i32
    %c0_i32_0 = arith.constant 0 : i32
    %c0_i32_1 = arith.constant 0 : i32
    return %arg0, %c0_i32, %c0_i32_0 : i32, i32, i32
  }
  func.func @transform_1(%arg0: i32, %arg1: i32) -> (i32, i32) {
    %c0_i32 = arith.constant 0 : i32
    %c0_i32_0 = arith.constant 0 : i32
    %c0_i32_1 = arith.constant 0 : i32
    return %c0_i32, %c0_i32_0 : i32, i32
  }
  func.func @transform_2(%arg0: i32, %arg1: i32) -> (i32, i32) {
    %c0_i32 = arith.constant 0 : i32
    %c0_i32_0 = arith.constant 0 : i32
    %c0_i32_1 = arith.constant 0 : i32
    return %c0_i32, %c0_i32_0 : i32, i32
  }
  func.func @transform_3(%arg0: i32, %arg1: i32) -> (i32, i32, i32) {
    %c0_i32 = arith.constant 0 : i32
    %c0_i32_0 = arith.constant 0 : i32
    %c0_i32_1 = arith.constant 0 : i32
    return %arg0, %c0_i32, %c0_i32_0 : i32, i32, i32
  }
  func.func @transform_4(%arg0: i32, %arg1: i32) -> (i32, i32, i32) {
    %c0_i32 = arith.constant 0 : i32
    %c0_i32_0 = arith.constant 0 : i32
    return %arg0, %arg1, %c0_i32 : i32, i32, i32
  }
}

module attributes {stable_mosaic.version = 11 : i64} {
  func.func @_mhsa_kernel(%arg0: i32, %arg1: i32, %arg2: memref<1x8x32xbf16, #tpu.memory_space<vmem>>, %arg3: memref<32x96xbf16, #tpu.memory_space<vmem>>, %arg4: memref<1x96xf32, #tpu.memory_space<vmem>>, %arg5: memref<1x1x8xf32, #tpu.memory_space<vmem>>, %arg6: memref<1x8x32xf32, #tpu.memory_space<vmem>>, %arg7: memref<4x8x8xbf16, #tpu.memory_space<vmem>>, %arg8: memref<4x8x8xbf16, #tpu.memory_space<vmem>>) attributes {dimension_semantics = [#tpu.dimension_semantics<parallel>, #tpu.dimension_semantics<arbitrary>], iteration_bounds = array<i64: 2, 1>, scalar_prefetch = 0 : i64, scratch_operands = 2 : i64, tpu.core_type = #tpu.core_type<tc>, window_params = [{transform_indices = @transform_0, window_bounds = array<i64: 1, 8, 32>}, {pipeline_mode = #tpu.pipeline_mode<synchronous>, transform_indices = @transform_1, window_bounds = array<i64: 32, 96>}, {pipeline_mode = #tpu.pipeline_mode<synchronous>, transform_indices = @transform_2, window_bounds = array<i64: 1, 96>}, {transform_indices = @transform_3, window_bounds = array<i64: 1, 1, 8>}, {transform_indices = @transform_4, window_bounds = array<i64: 1, 8, 32>}]} {
    %c0_i32 = arith.constant 0 : i32
    %0 = arith.cmpi eq, %arg1, %c0_i32 : i32
    %1 = arith.extui %0 : i1 to i32
    %c0_i32_0 = arith.constant 0 : i32
    %2 = arith.cmpi ne, %1, %c0_i32_0 : i32
    scf.if %2 {
      %c0_25 = arith.constant 0 : index
      %c0_26 = arith.constant 0 : index
      %c0_27 = arith.constant 0 : index
      %47 = vector.load %arg2[%c0_25, %c0_26, %c0_27] : memref<1x8x32xbf16, #tpu.memory_space<vmem>>, vector<1x8x32xbf16>
      %48 = vector.shape_cast %47 : vector<1x8x32xbf16> to vector<8x32xbf16>
      %c0_28 = arith.constant 0 : index
      %c32 = arith.constant 32 : index
      %49 = vector.load %arg3[%c0_28, %c32] : memref<32x96xbf16, #tpu.memory_space<vmem>>, vector<32x64xbf16>
      %cst_29 = arith.constant dense<0.000000e+00> : vector<8x64xf32>
      %50 = tpu.matmul %48, %49, %cst_29 {dimension_numbers = #tpu.dot_dimension_numbers<[1], [0], [0], [1], [0, 0, 1, 1], [], []>} : vector<8x32xbf16>, vector<32x64xbf16>, vector<8x64xf32> -> vector<8x64xf32>
      %c0_30 = arith.constant 0 : index
      %c32_31 = arith.constant 32 : index
      %51 = vector.load %arg4[%c0_30, %c32_31] : memref<1x96xf32, #tpu.memory_space<vmem>>, vector<1x64xf32>
      %52 = vector.broadcast %51 : vector<1x64xf32> to vector<8x64xf32>
      %53 = arith.addf %50, %52 : vector<8x64xf32>
      %54 = vector.extract_strided_slice %53 {offsets = [0, 0], sizes = [8, 32], strides = [1, 1]} : vector<8x64xf32> to vector<8x32xf32>
      %55 = arith.truncf %54 : vector<8x32xf32> to vector<8x32xbf16>
      %56 = vector.extract_strided_slice %53 {offsets = [0, 32], sizes = [8, 32], strides = [1, 1]} : vector<8x64xf32> to vector<8x32xf32>
      %57 = arith.truncf %56 : vector<8x32xf32> to vector<8x32xbf16>
      %58 = vector.shape_cast %55 : vector<8x32xbf16> to vector<8x4x8xbf16>
      %59 = tpu.transpose %58, [1, 0, 2] : vector<8x4x8xbf16> -> vector<4x8x8xbf16>
      %c0_32 = arith.constant 0 : index
      %c0_33 = arith.constant 0 : index
      %c0_34 = arith.constant 0 : index
      %60 = vector.load %arg7[%c0_32, %c0_33, %c0_34] : memref<4x8x8xbf16, #tpu.memory_space<vmem>>, vector<4x8x8xbf16>
      tpu.vector_store %arg7[%c0_32, %c0_33, %c0_34], %59 {strides = array<i32>} : memref<4x8x8xbf16, #tpu.memory_space<vmem>>, vector<4x8x8xbf16>,
      %61 = vector.shape_cast %57 : vector<8x32xbf16> to vector<8x4x8xbf16>
      %62 = tpu.transpose %61, [1, 0, 2] : vector<8x4x8xbf16> -> vector<4x8x8xbf16>
      %c0_35 = arith.constant 0 : index
      %c0_36 = arith.constant 0 : index
      %c0_37 = arith.constant 0 : index
      %63 = vector.load %arg8[%c0_35, %c0_36, %c0_37] : memref<4x8x8xbf16, #tpu.memory_space<vmem>>, vector<4x8x8xbf16>
      tpu.vector_store %arg8[%c0_35, %c0_36, %c0_37], %62 {strides = array<i32>} : memref<4x8x8xbf16, #tpu.memory_space<vmem>>, vector<4x8x8xbf16>,
    } else {
    }
    %c8_i32 = arith.constant 8 : i32
    %3 = arith.muli %arg1, %c8_i32 : i32
    %4 = tpu.assume_multiple %3, 8 : i32
    %c0 = arith.constant 0 : index
    %5 = arith.index_cast %4 : i32 to index
    %c0_1 = arith.constant 0 : index
    %6 = vector.load %arg2[%c0, %5, %c0_1] : memref<1x8x32xbf16, #tpu.memory_space<vmem>>, vector<1x8x32xbf16>
    %7 = vector.shape_cast %6 : vector<1x8x32xbf16> to vector<8x32xbf16>
    %c0_2 = arith.constant 0 : index
    %c0_3 = arith.constant 0 : index
    %8 = vector.load %arg3[%c0_2, %c0_3] : memref<32x96xbf16, #tpu.memory_space<vmem>>, vector<32x32xbf16>
    %cst = arith.constant dense<0.000000e+00> : vector<8x32xf32>
    %9 = tpu.matmul %7, %8, %cst {dimension_numbers = #tpu.dot_dimension_numbers<[1], [0], [0], [1], [0, 0, 1, 1], [], []>} : vector<8x32xbf16>, vector<32x32xbf16>, vector<8x32xf32> -> vector<8x32xf32>
    %c0_4 = arith.constant 0 : index
    %c0_5 = arith.constant 0 : index
    %10 = vector.load %arg4[%c0_4, %c0_5] : memref<1x96xf32, #tpu.memory_space<vmem>>, vector<1x32xf32>
    %11 = vector.broadcast %10 : vector<1x32xf32> to vector<8x32xf32>
    %12 = arith.addf %9, %11 : vector<8x32xf32>
    %cst_6 = arith.constant 0.353553385 : f32
    %13 = vector.broadcast %cst_6 : f32 to vector<8x32xf32>
    %14 = arith.mulf %12, %13 : vector<8x32xf32>
    %15 = arith.truncf %14 : vector<8x32xf32> to vector<8x32xbf16>
    %16 = vector.shape_cast %15 : vector<8x32xbf16> to vector<8x4x8xbf16>
    %17 = tpu.transpose %16, [1, 0, 2] : vector<8x4x8xbf16> -> vector<4x8x8xbf16>
    %c0_7 = arith.constant 0 : index
    %c0_8 = arith.constant 0 : index
    %c0_9 = arith.constant 0 : index
    %18 = vector.load %arg7[%c0_7, %c0_8, %c0_9] : memref<4x8x8xbf16, #tpu.memory_space<vmem>>, vector<4x8x8xbf16>
    "tpu.trace_start"() <{level = 10 : i32, message = "hqw,hkw->hqk"}> : () -> ()
    %cst_10 = arith.constant dense<0.000000e+00> : vector<4x8x8xf32>
    %19 = tpu.matmul %17, %18, %cst_10 {dimension_numbers = #tpu.dot_dimension_numbers<[2], [2], [1], [1], [0, 0, 0, 1, 1, 1], [0], [0]>} : vector<4x8x8xbf16>, vector<4x8x8xbf16>, vector<4x8x8xf32> -> vector<4x8x8xf32>
    "tpu.trace_stop"() : () -> ()
    %c0_11 = arith.constant 0 : index
    %c0_12 = arith.constant 0 : index
    %c0_13 = arith.constant 0 : index
    %20 = vector.load %arg5[%c0_11, %c0_12, %c0_13] : memref<1x1x8xf32, #tpu.memory_space<vmem>>, vector<1x1x8xf32>
    %21 = vector.shape_cast %20 : vector<1x1x8xf32> to vector<1x8xf32>
    %cst_14 = arith.constant 1.000000e+00 : f32
    %22 = vector.broadcast %cst_14 : f32 to vector<1x8xf32>
    %23 = arith.subf %22, %21 : vector<1x8xf32>
    %cst_15 = arith.constant 1.000000e+04 : f32
    %24 = vector.broadcast %cst_15 : f32 to vector<1x8xf32>
    %25 = arith.mulf %24, %23 : vector<1x8xf32>
    %26 = vector.shape_cast %25 : vector<1x8xf32> to vector<1x1x8xf32>
    %27 = vector.broadcast %26 : vector<1x1x8xf32> to vector<4x8x8xf32>
    %28 = arith.subf %19, %27 : vector<4x8x8xf32>
    %cst_16 = arith.constant dense<0xFF800000> : vector<4x8xf32>
    %29 = vector.multi_reduction <maximumf>, %28, %cst_16 [2] : vector<4x8x8xf32> to vector<4x8xf32>
    %30 = vector.shape_cast %29 : vector<4x8xf32> to vector<4x8x1xf32>
    %31 = vector.broadcast %30 : vector<4x8x1xf32> to vector<4x8x8xf32>
    %32 = arith.subf %28, %31 : vector<4x8x8xf32>
    %33 = math.exp %32 : vector<4x8x8xf32>
    %cst_17 = arith.constant dense<0.000000e+00> : vector<4x8xf32>
    %34 = vector.multi_reduction <add>, %33, %cst_17 [2] : vector<4x8x8xf32> to vector<4x8xf32>
    %35 = vector.shape_cast %34 : vector<4x8xf32> to vector<4x8x1xf32>
    %36 = tpu.reciprocal %35 {approx = true} : vector<4x8x1xf32> -> vector<4x8x1xf32>
    %37 = vector.broadcast %36 : vector<4x8x1xf32> to vector<4x8x8xf32>
    %38 = arith.mulf %33, %37 : vector<4x8x8xf32>
    %39 = arith.truncf %38 : vector<4x8x8xf32> to vector<4x8x8xbf16>
    %c0_18 = arith.constant 0 : index
    %c0_19 = arith.constant 0 : index
    %c0_20 = arith.constant 0 : index
    %40 = vector.load %arg8[%c0_18, %c0_19, %c0_20] : memref<4x8x8xbf16, #tpu.memory_space<vmem>>, vector<4x8x8xbf16>
    "tpu.trace_start"() <{level = 10 : i32, message = "hqk,hkw->hqw"}> : () -> ()
    %cst_21 = arith.constant dense<0.000000e+00> : vector<4x8x8xf32>
    %41 = tpu.matmul %39, %40, %cst_21 {dimension_numbers = #tpu.dot_dimension_numbers<[2], [1], [1], [2], [0, 0, 0, 1, 1, 2], [0], [0]>} : vector<4x8x8xbf16>, vector<4x8x8xbf16>, vector<4x8x8xf32> -> vector<4x8x8xf32>
    "tpu.trace_stop"() : () -> ()
    %42 = tpu.transpose %41, [1, 0, 2] : vector<4x8x8xf32> -> vector<8x4x8xf32>
    %43 = vector.shape_cast %42 : vector<8x4x8xf32> to vector<8x32xf32>
    %c0_22 = arith.constant 0 : index
    %c0_23 = arith.constant 0 : index
    %c0_24 = arith.constant 0 : index
    %44 = vector.load %arg6[%c0_22, %c0_23, %c0_24] : memref<1x8x32xf32, #tpu.memory_space<vmem>>, vector<1x8x32xf32>
    %45 = vector.shape_cast %44 : vector<1x8x32xf32> to vector<8x32xf32>
    %46 = vector.shape_cast %43 : vector<8x32xf32> to vector<1x8x32xf32>
    tpu.vector_store %arg6[%c0_22, %c0_23, %c0_24], %46 {strides = array<i32>} : memref<1x8x32xf32, #tpu.memory_space<vmem>>, vector<1x8x32xf32>,
    return
  }
  func.func @transform_0(%arg0: i32, %arg1: i32) -> (i32, i32, i32) {
    %c0_i32 = arith.constant 0 : i32
    %c0_i32_0 = arith.constant 0 : i32
    %c0_i32_1 = arith.constant 0 : i32
    return %arg0, %c0_i32, %c0_i32_0 : i32, i32, i32
  }
  func.func @transform_1(%arg0: i32, %arg1: i32) -> (i32, i32) {
    %c0_i32 = arith.constant 0 : i32
    %c0_i32_0 = arith.constant 0 : i32
    %c0_i32_1 = arith.constant 0 : i32
    return %c0_i32, %c0_i32_0 : i32, i32
  }
  func.func @transform_2(%arg0: i32, %arg1: i32) -> (i32, i32) {
    %c0_i32 = arith.constant 0 : i32
    %c0_i32_0 = arith.constant 0 : i32
    %c0_i32_1 = arith.constant 0 : i32
    return %c0_i32, %c0_i32_0 : i32, i32
  }
  func.func @transform_3(%arg0: i32, %arg1: i32) -> (i32, i32, i32) {
    %c0_i32 = arith.constant 0 : i32
    %c0_i32_0 = arith.constant 0 : i32
    %c0_i32_1 = arith.constant 0 : i32
    return %arg0, %c0_i32, %c0_i32_0 : i32, i32, i32
  }
  func.func @transform_4(%arg0: i32, %arg1: i32) -> (i32, i32, i32) {
    %c0_i32 = arith.constant 0 : i32
    %c0_i32_0 = arith.constant 0 : i32
    return %arg0, %arg1, %c0_i32 : i32, i32, i32
  }
}

</mosaic_0001>

<bundles_post_ra>
// kernel: tpu_custom_call.1
= control target key start
LH: loop header
LB: loop body
LE: loop exit
PB: predicated region body
PF: predicated region fallthrough
CT: control target
= control target key end

     0   :  { %9 = vsyncpa [#allocation5], 0  ;;  %s2478_s0 = inlined_call_operand.hbm [shape: bf16[2,8,32], index: 0, kind: input, shape index: {}]   ;;  %s2479_s1 = inlined_call_operand.hbm [shape: bf16[32,96], index: 1, kind: input, shape index: {}]   ;;  %s2480_s2 = inlined_call_operand.vmem [shape: f32[1,96], index: 2, kind: input, shape index: {}]   ;;  %s2481_s3 = inlined_call_operand.vmem [shape: f32[2,1,8], index: 3, kind: input, shape index: {}]   ;;  %s2482_s4 = inlined_call_operand.hbm [shape: f32[2,8,32], index: 4, kind: output, shape index: {}]  }
   0x1   :  { %11 = vsyncpa [#allocation5 + $0x1], 0 }
   0x2   :  { %12 = vsyncpa [#allocation8], 0 }
   0x3   :  { %13 = vsyncpa [#allocation6], 0 }
   0x4   :  { %15 = vsyncpa [#allocation6 + $0x1], 0  ;;  %s2056_s15 = smov 0   ;;  %s2058_s16 = smov 0  }
   0x5   :  { %s2060_s17 = smov 0   ;;  %s2062_s18 = smov 0  }
   0x6   :  { %s2064_s19 = smov 0   ;;  %s2066_s20 = smov 0  }
   0x7 LB: > { %s1642_s21 = sadd.s32 4294967295, %s2012_s20   ;;  %s1643_s22 = sadd.s32 4294967294, %s2012_s20   ;;  %s2012_s20 = sphi %s2066_s20, %s21_s20   ;;  %s2008_s19 = sphi %s2064_s19, %s2506_s19   ;;  %s2004_s18 = sphi %s2062_s18, %s2505_s18   ;;  %s2000_s17 = sphi %s2060_s17, %s2504_s17   ;;  %s1996_s16 = sphi %s2058_s16, %s2503_s16   ;;  %s1992_s15 = sphi %s2056_s15, %s2502_s15  }
   0x8   : > { %p53_p0 = scmp.ne.s32.totalorder %s1996_s16, %s1992_s15  ;;  %p2090_p1 = scmp.eq.s32.totalorder %s1642_s21, 0 }
   0x9   : > { %p2094_p2 = scmp.eq.s32.totalorder %s1642_s21, 1  ;;  %p153_p3 = scmp.eq.s32.totalorder %s1643_s22, 1 }
   0xa   : > { %s2487_s23 = scalar_select %p2090_p1, 1, 0 }
   0xb   : > { %s2488_s24 = scalar_select %p2094_p2, 1, 0 }
   0xc   : > { %p2100_p4 = por %p2090_p1, %p53_p0  ;;  %p1644_p5 = scmp.ge.s32.totalorder %s2012_s20, 1 }
   0xd   : > { %p2105_p6 = por %p153_p3, %p53_p0  ;;  %p160_p7 = scmp.lt.s32.totalorder %s2012_s20, 3 }
   0xe   : > { %s2489_s25 = scalar_select %p2100_p4, 1, 0 }
   0xf   : > { %s2490_s26 = scalar_select %p2105_p6, 1, 0 }
  0x10   : > { %p2110_p8 = pnand %p1644_p5, %p160_p7  ;;  %s2014_s28 = smov [#allocation7]  }
  0x11   : > { %s172_s29 = sshll.u32 %s2014_s28, 4  ;;  %s33_s5 = sadd.s32 1, %s2008_s19  ;;  %s173_s29 = int_to_ptr.vmem [resolvable:$true] %s172_s29 }
  0x12   : > { %s2491_s27 = scalar_select %p2110_p8, 1, 0 }
  0x13   : > { %p1769_p9 = pneg %p2110_p8  ;;  %s1868_s8 = scalar_lea.hbm %s2479_s1, 256 }
  0x14   : > { %p1869_p12 = scmp.ne.s32.totalorder %s2479_s1, %s1868_s8  ;;  %p1875_p5 = scmp.lt.u32.totalorder %s1868_s8, %s2479_s1 }
  0x15   : > { %p2119_p11 = pnand %p1769_p9, %p2090_p1 }
  0x17   : > { %p1870_p13 = pneg %p2119_p11 }
  0x19   : > { %p1871_p0 = pnand %p1870_p13, %p1869_p12 }
  0x1b   : > { %p1872_p3 = pneg %p1871_p0 }
  0x1d   : > { %p1877_p7 = pnand %p1875_p5, %p1872_p3 }
  0x1f   : > { %1880 = shalt.err (!%p1877_p7)
}
  0x20   : > { %s1881_s13 = scalar_lea.vmem %s173_s29, 256  ;;  %p1889_p1 = scmp.lt.s32.totalorder %s173_s29, %s173_s29 }
  0x21   : > { %p1882_p9 = scmp.ne.s32.totalorder %s173_s29, %s1881_s13  ;;  %p1890_p4 = scmp.lt.s32.totalorder %s1881_s13, %s1881_s13 }
  0x23   : > { %p1884_p10 = pnand %p1882_p9, %p1870_p13  ;;  %p1891_p8 = por %p1890_p4, %p1889_p1 }
  0x25   : > { %p1885_p6 = pneg %p1884_p10 }
  0x27   : > { %p1892_p2 = pnand %p1891_p8, %p1885_p6 }
  0x29   : > { %1895 = shalt.err (!%p1892_p2)
}
  0x2a   : > { %s2015_s14 = smov 64   ;;  %s2016_s21 = smov 4  }
  0x2b   : > { %1772 = dma.hbm_to_vmem [thread:$0]  (!%p2119_p11), %s2479_s1, 256, %s173_s29, [#allocation8], %s2015_s14, %s2015_s14, %s2016_s21  }
  0x2c   : > { %p35_p1 = scmp.ge.s32.totalorder %s33_s5, 2  ;;  %s40_s6 = sadd.s32 1, %s2000_s17 }
  0x2d   : > { %p47_p2 = scmp.ne.s32.totalorder %s2000_s17, %s1996_s16  ;;  %p48_p4 = scmp.eq.s32.totalorder %s2012_s20, 0 }
  0x2e   : > { %s2508_s5 = smov (%p35_p1, %s33_s5), 0  ;;  %p2494_p8 = scmp.ne.s32.totalorder %s2488_s24, 0 }
  0x2f   : > { %p2146_p6 = por %p48_p4, %p47_p2  ;;  %s37_s30 = ssub.s32 %s2008_s19, %s2508_s5 }
  0x30   : > { %p2152_p10 = por %p2494_p8, %p47_p2  ;;  %p1782_p12 = scmp.lt.s32.totalorder %s2012_s20, 2 }
  0x31   : > { %p38_p11 = scmp.eq.s32.totalorder %s37_s30, 0  ;;  %s189_s29 = sand.u32 1, %s2000_s17  }
  0x32   : > { %s1647_s9 = sshll.u32 %s189_s29, 2  ;;  %s1648_s11 = sshll.u32 %s2008_s19, 6 }
  0x33   : > { %s2161_s10 = scalar_select %p38_p11, %s2000_s17, %s40_s6  }
  0x34   : > { %s2167_s14 = scalar_lea.hbm %s2478_s0, %s1648_s11  ;;  %s193_s24 = scalar_lea.vmem [#allocation4], %s1647_s9 }
  0x35   : > { %s200_s21 = sshll.u32 %s193_s24, 4  ;;  %p2173_p13 = pnand %p1782_p12, %p2146_p6  ;;  %s2169_s21 = int_to_ptr.vmem [resolvable:$true] %s200_s21 }
  0x36   : > { %s190_s28 = scalar_lea.sflag [#allocation5], %s189_s29  ;;  %s1896_s6 = scalar_lea.hbm %s2167_s14, 64 }
  0x37   : > { %p1897_p0 = scmp.ne.s32.totalorder %s2167_s14, %s1896_s6  ;;  %p1898_p3 = pneg %p2173_p13 }
  0x38   : > { %s1901_s11 = scalar_lea.hbm %s2478_s0, 128  ;;  %p1902_p9 = scmp.lt.u32.totalorder %s2167_s14, %s2478_s0 }
  0x39   : > { %p1899_p5 = pnand %p1898_p3, %p1897_p0  ;;  %p1903_p1 = scmp.lt.u32.totalorder %s1901_s11, %s1896_s6 }
  0x3a   : > { %p1905_p4 = scmp.lt.u32.totalorder %s1896_s6, %s2167_s14 }
  0x3b   : > { %p1900_p7 = pneg %p1899_p5  ;;  %p1904_p2 = por %p1903_p1, %p1902_p9 }
  0x3d   : > { %p1906_p6 = por %p1905_p4, %p1904_p2 }
  0x3f   : > { %p1907_p8 = pnand %p1906_p6, %p1900_p7 }
  0x41   : > { %1910 = shalt.err (!%p1907_p8)
}
  0x42   : > { %s1911_s29 = scalar_lea.vmem %s2169_s21, 64  ;;  %s2017_s13 = smov [#allocation4]  }
  0x43   : > { %p1912_p12 = scmp.ne.s32.totalorder %s2169_s21, %s1911_s29  ;;  %s1916_s24 = sshll.u32 %s2017_s13, 4  ;;  %s1917_s24 = int_to_ptr.vmem [resolvable:$false] %s1916_s24 }
  0x44   : > { %s1918_s30 = scalar_lea.vmem %s1917_s24, 128  ;;  %p1919_p5 = scmp.lt.s32.totalorder %s2169_s21, %s1917_s24 }
  0x45   : > { %p1914_p11 = pnand %p1912_p12, %p1898_p3  ;;  %p1920_p9 = scmp.lt.s32.totalorder %s1918_s30, %s1911_s29 }
  0x47   : > { %p1915_p0 = pneg %p1914_p11  ;;  %p1921_p1 = por %p1920_p9, %p1919_p5 }
  0x49   : > { %p1922_p2 = pnand %p1921_p1, %p1915_p0 }
  0x4b   : > { %1925 = shalt.err (!%p1922_p2)
}
  0x4c   : > { %1776 = dma.hbm_to_vmem [thread:$0]  (!%p2173_p13), %s2167_s14, 64, %s2169_s21, %s190_s28  }
  0x4d   : > { %p2497_p7 = scmp.ne.s32.totalorder %s2491_s27, 0 }
  0x4e   : > { %s2205_s6 = sand.u32 (!%p2497_p7), 1, %s1996_s16   ;;  %p2498_p3 = scmp.ne.s32.totalorder (!%p2497_p7), %s2489_s25, 0 }
  0x4f   : > { %215 = sbr.rel (%p2497_p7) target bundleno = 1494 (0x5d6), region = 36  ;;  %s1650_s9 = sshll.u32 (!%p2497_p7), %s2205_s6, 2 }
  0x50   : > { %s218_s11 = scalar_lea.sflag (!%p2497_p7), [#allocation5], %s2205_s6  ;;  %s2209_s7 = scalar_lea.vmem (!%p2497_p7), [#allocation4], %s1650_s9 }
  0x56   : > { %1979 = dma.done.wait (%p2498_p3), %s218_s11, 64  }
  0x57   : > { %1981 = vsyncadd (%p2498_p3), %s218_s11, 4294967232  ;;  %p2499_p13 = scmp.ne.s32.totalorder %s2487_s23, 0 }
  0x59   : > { %1983 = dma.done.wait (%p2499_p13), [#allocation8], 256  }
  0x5a   : > { %1985 = vsyncadd (%p2499_p13), [#allocation8], 4294967040  ;;  %v2018_v0 = vmov 0.0   ;;  %vm2019_vm0 = vmmov 0   ;;  %v1848_v1 = vld [vmem:[#allocation7] sm:$0xff]   ;;  %v1849_v2 = vld [vmem:[#allocation7 + $0x8] sm:$0xff]   ;;  %v346_v26 = vlaneseq }
  0x5b   : > { %1697 = vmatprep.subr.bf16.mxu0 %v2018_v0  ;;  %1705 = vmatprep.subr.bf16.mxu1 %v2018_v0  ;;  %s2020_s25 = smov 96   ;;  %v1850_v3 = vld [vmem:[#allocation7] sm:$0xff]   ;;  %v1851_v4 = vld [vmem:[#allocation7 + $0x8] sm:$0xff]   ;;  %v1653_v5 = vld [vmem:[%s2480_s2] ss:$0 sm:$0xff]  ;;  %vm291_vm1 = vcmask 261120  }
  0x5c   : > { %1701 = vmatprep.mubr.msk.bf16.mxu0 %vm2019_vm0, %v2018_v0  ;;  %1709 = vmatprep.mubr.msk.bf16.mxu1 %vm2019_vm0, %v2018_v0  ;;  %v696_v6 = vld [vmem:[%s2209_s7] sm:$0xf]  ;;  %s2021_s14 = smov 112   ;;  %s2022_s21 = smov 120   ;;  %v2024_v24 = vmov 1983009808  }
  0x5d   : > { %282 = vrot.lane.b32.xlu0 %v1848_v1, %s2020_s25  ;;  %1706 = vmatpush3.bf16.msra.mxu1 %v1850_v3  ;;  %v261_v9 = vld [vmem:[%s2209_s7] sm:$0xf]  ;;  %s2023_s22 = smov 104   ;;  %v344_v25 = vunpack.c.l.s4 %v2024_v24  ;;  %v2248_v28 = vshrl.u32 %v346_v26, 7  ;;  %v2025_v29 = vmov 1934713408  }
  0x5e   : > { %1707 = vmatprep.subr.bf16.mxu1 %v2018_v0  ;;  %288 = vrot.lane.b32.xlu1 %v1653_v5, %s2020_s25  ;;  %v361_v30 = vunpack.c.l.s4 %v2025_v29  ;;  %v2026_v46 = vmov 0   ;;  %vm508_vm2 = vcmask 60416   ;;  %vm938_vm3 = vcmask 64512   ;;  %p253_p4 = scmp.lt.s32.totalorder %s2004_s18, 1  ;;  %s2027_s24 = smov 16  }
  0x5f   : > { %v345_v27 = vunpack.c.0.s8 %v344_v25  ;;  %vm1191_vm4 = vcmask 1043456   ;;  %s2028_s30 = smov 8   ;;  %s2029_s9 = smov 24   ;;  %vm1522_vm5 = vcmask 130048   ;;  %vm1524_vm6 = vcmask 195584  }
  0x60   : > { %v362_v32 = vunpack.c.0.s8 %v361_v30  ;;  %s254_s28 = scalar_select %p253_p4, %s2004_s18, 1 }
  0x61   : > { %284 = vrot.lane.b32.xlu0 %v1849_v2, %s2020_s25  ;;  %1708 = vmatpush3.bf16.msra.mxu1 %v1851_v4  ;;  %v2251_v31 = vsub.s32 %v345_v27, %v2248_v28  ;;  %s1652_s11 = sshll.u32 %s2205_s6, 3  ;;  %s1672_s7 = sshll.u32 %s2004_s18, 7 }
  0x62   : > { %1719 = vmatprep.subr.bf16.mxu1 %v2018_v0  ;;  %v2258_v35 = vsub.s32 %v362_v32, %v2248_v28  ;;  %s255_s13 = scalar_lea.vmem %s2481_s3, %s254_s28  ;;  %s2030_s28 = smov [#allocation9]  }
  0x63   : > { %s1930_s12 = sshll.u32 %s2030_s28, 4  ;;  %s1931_s12 = int_to_ptr.vmem [resolvable:$false] %s1930_s12 }
  0x64   : > { %1710 = vmatmul.mubr.msk.bf16.vlgmr.msra.gmra.mrb[0].mxu1 %vm291_vm1, %v696_v6  ;;  %s1932_s29 = scalar_lea.vmem %s1931_s12, 256 }
  0x65   : > { %1721 = vmatprep.mubr.msk.bf16.mxu1 %vm2019_vm0, %v2018_v0 }
  0xcf   : > { %v283_v7 = vpop.permute.xlu0 %282 }
  0xd0   : > { %1698 = vmatpush3.bf16.msra.mxu0 %v283_v7  ;;  %v289_v15 = vpop.permute.xlu1 %288 }
  0xd1   : > { %1699 = vmatprep.subr.bf16.mxu0 %v2018_v0 }
  0xd3   : > { %v285_v8 = vpop.permute.xlu0 %284 }
  0xd4   : > { %1700 = vmatpush3.bf16.msra.mxu0 %v285_v8 }
  0xd5   : > { %1713 = vmatprep.subr.bf16.mxu0 %v2018_v0 }
  0xd7   : > { %1702 = vmatmul.mubr.msk.bf16.vlgmr.msra.gmra.mrb[0].mxu0 %vm291_vm1, %v261_v9 }
  0xd8   : > { %1715 = vmatprep.mubr.msk.bf16.mxu0 %vm2019_vm0, %v2018_v0 }
 0x137   : > { %v758_v10 = vpop.f32.mrb[0].mxu1 }
 0x138   : > { %v1711_v11 = vpop.f32.mrb[1].mxu1  ;;  %v759_v14 = vadd.f32 %v1653_v5, %v758_v10 }
 0x139   : > { %v761_v12 = vpop.f32.mrb[2].mxu1 }
 0x13a   : > { %v1712_v13 = vpop.f32.mrb[3].mxu1  ;;  %v764_v19 = vmul.f32 0.35355338, %v759_v14 }
 0x13c   : > { %v765_v23 = vpack.c.bf16 %v764_v19, %v764_v19 }
 0x13e   : > { %v779_v53 = vrot.slane %v765_v23, %v2251_v31 }
 0x1aa   : > { %v329_v16 = vpop.f32.mrb[0].mxu0 }
 0x1ab   : > { %v330_v17 = vadd.f32 %v329_v16, %v289_v15  ;;  %v1703_v18 = vpop.f32.mrb[1].mxu0 }
 0x1ac   : > { %v332_v20 = vpop.f32.mrb[2].mxu0 }
 0x1ad   : > { %v2243_v21 = vpack.c.bf16 %v330_v17, %v330_v17  ;;  %v1704_v22 = vpop.f32.mrb[3].mxu0 }
 0x1af   : > { %339 = vrot.lane.b32.xlu0 %v2243_v21, %s2021_s14  ;;  %337 = vrot.lane.b32.xlu1 %v2243_v21, %s2022_s21  ;;  %v349_v36 = vrot.slane %v2243_v21, %v2251_v31 }
 0x1b3   : > { %767 = vrot.lane.b32.xlu0 %v765_v23, %s2022_s21  ;;  %341 = vrot.lane.b32.xlu1 %v2243_v21, %s2023_s22  ;;  %s2428_s21 = scalar_lea.hbm %s2482_s4, %s1672_s7 }
 0x1b7   : > { %771 = vrot.lane.b32.xlu0 %v765_v23, %s2023_s22  ;;  %769 = vrot.lane.b32.xlu1 %v765_v23, %s2021_s14  ;;  %s1528_s22 = scalar_lea.sflag [#allocation6], %s2205_s6 }
 0x221   : > { %v2253_v33 = vpop.permute.xlu0 %339  ;;  %v2255_v34 = vpop.permute.xlu1 %337 }
 0x222   : > { %v357_v37 = vrot.slane %v2253_v33, %v2251_v31  ;;  %v383_v45 = vrot.slane %v2255_v34, %v2251_v31 }
 0x224   : > { %v358_v38 = vcombine.low %v349_v36, %v357_v37  ;;  %v359_v39 = vcombine.high %v349_v36, %v357_v37 }
 0x225   : > { %v768_v40 = vpop.permute.xlu0 %767  ;;  %v2264_v41 = vpop.permute.xlu1 %341 }
 0x226   : > { %v366_v42 = vrot.slane %v358_v38, %v2258_v35  ;;  %v373_v43 = vrot.slane %v359_v39, %v2258_v35  ;;  %v391_v44 = vrot.slane %v2264_v41, %v2251_v31  ;;  %v813_v49 = vrot.slane %v768_v40, %v2251_v31 }
 0x228   : > { %v374_v47 = vcombine.high %v366_v42, %v2026_v46  ;;  %v375_v48 = vcombine.high %v373_v43, %v2026_v46  ;;  %v392_v50 = vcombine.low %v383_v45, %v391_v44  ;;  %v393_v51 = vcombine.high %v383_v45, %v391_v44 }
 0x229   : > { %v772_v52 = vpop.permute.xlu0 %771  ;;  %v770_v54 = vpop.permute.xlu1 %769  ;;  %v414_v55 = vshrl.u32 %v366_v42, 16  ;;  %v430_v56 = vshrl.u32 %v373_v43, 16 }
 0x22a   : > { %v821_v57 = vrot.slane %v772_v52, %v2251_v31  ;;  %v787_v58 = vrot.slane %v770_v54, %v2251_v31  ;;  %v422_v59 = vshrl.u32 %v374_v47, 16  ;;  %v438_v60 = vshrl.u32 %v375_v48, 16 }
 0x22b   : > { %v400_v61 = vrot.slane %v392_v50, %v2258_v35  ;;  %v407_v62 = vrot.slane %v393_v51, %v2258_v35 }
 0x22c   : > { %v822_v63 = vcombine.low %v813_v49, %v821_v57  ;;  %v823_v1 = vcombine.high %v813_v49, %v821_v57  ;;  %v788_v2 = vcombine.low %v779_v53, %v787_v58  ;;  %v789_v3 = vcombine.high %v779_v53, %v787_v58 }
 0x22d   : > { %v408_v4 = vcombine.high %v400_v61, %v2026_v46  ;;  %v409_v5 = vcombine.high %v407_v62, %v2026_v46  ;;  %v412_v6 = vpack.i.b16 %v400_v61, %v366_v42  ;;  %v415_v7 = vshrl.u32 %v400_v61, 16 }
 0x22e   : > { %v428_v8 = vpack.i.b16 %v407_v62, %v373_v43  ;;  %v431_v9 = vshrl.u32 %v407_v62, 16  ;;  %v830_v10 = vrot.slane %v822_v63, %v2258_v35  ;;  %v837_v11 = vrot.slane %v823_v1, %v2258_v35 }
 0x22f   : > { %v416_v12 = vpack.i.b16 %v415_v7, %v414_v55  ;;  %v420_v13 = vpack.i.b16 %v408_v4, %v374_v47  ;;  %v423_v14 = vshrl.u32 %v408_v4, 16  ;;  %v436_v15 = vpack.i.b16 %v409_v5, %v375_v48 }
 0x230   : > { %v432_v16 = vpack.i.b16 %v431_v9, %v430_v56  ;;  %v439_v17 = vshrl.u32 %v409_v5, 16  ;;  %v442_v18 = vcombine.low %v412_v6, %v428_v8  ;;  %v838_v19 = vcombine.high %v830_v10, %v2026_v46 }
 0x231   : > { %v424_v20 = vpack.i.b16 %v423_v14, %v422_v59  ;;  %v450_v22 = vcombine.low %v420_v13, %v436_v15  ;;  %v839_v23 = vcombine.high %v837_v11, %v2026_v46  ;;  %v845_v29 = vshrl.u32 %v830_v10, 16 }
 0x232   : > { %v440_v24 = vpack.i.b16 %v439_v17, %v438_v60  ;;  %v467_v25 = vcombine.low %v416_v12, %v432_v16  ;;  %v449_v26 = vrot.slane %v442_v18, %v2251_v31  ;;  %v796_v30 = vrot.slane %v788_v2, %v2258_v35 }
 0x233   : > { %v457_v27 = vrot.slane %v450_v22, %v2251_v31  ;;  %v853_v36 = vshrl.u32 %v838_v19, 16  ;;  %v861_v37 = vshrl.u32 %v837_v11, 16  ;;  %v803_v38 = vrot.slane %v789_v3, %v2258_v35 }
 0x234   : > { %v475_v32 = vcombine.low %v424_v20, %v440_v24  ;;  %v869_v40 = vshrl.u32 %v839_v23, 16  ;;  %v804_v42 = vcombine.high %v796_v30, %v2026_v46  ;;  %v844_v43 = vshrl.u32 %v796_v30, 16 }
 0x235   : > { %v458_v39 = vcombine.low %v449_v26, %v457_v27  ;;  %v474_v44 = vrot.slane %v467_v25, %v2251_v31  ;;  %v805_v47 = vcombine.high %v803_v38, %v2026_v46  ;;  %v860_v48 = vshrl.u32 %v803_v38, 16 }
 0x236   : > { %v482_v45 = vrot.slane %v475_v32, %v2251_v31  ;;  %v846_v50 = vpack.i.b16 %v845_v29, %v844_v43  ;;  %v850_v51 = vpack.i.b16 %v838_v19, %v804_v42  ;;  %v852_v52 = vshrl.u32 %v804_v42, 16 }
 0x237   : > { %v465_v49 = vrot.slane %v458_v39, %v2258_v35  ;;  %v862_v54 = vpack.i.b16 %v861_v37, %v860_v48  ;;  %v866_v55 = vpack.i.b16 %v839_v23, %v805_v47  ;;  %v868_v56 = vshrl.u32 %v805_v47, 16  ;;  %v1123_v47 = vld [vmem:[%s255_s13] sm:$0x1] }
 0x238   : > { %v483_v53 = vcombine.low %v474_v44, %v482_v45  ;;  %v842_v57 = vpack.i.b16 %v830_v10, %v796_v30  ;;  %v854_v58 = vpack.i.b16 %v853_v36, %v852_v52  ;;  %v858_v59 = vpack.i.b16 %v837_v11, %v803_v38 }
 0x239   : > { %v466_v60 = vcombine.high %v465_v49, %v2026_v46  ;;  %v870_v62 = vpack.i.b16 %v869_v40, %v868_v56  ;;  %v496_v63 = vshrl.u32 %v465_v49, 16  ;;  %v880_v1 = vcombine.low %v850_v51, %v866_v55 }
 0x23a   : > { %v490_v61 = vrot.slane %v483_v53, %v2258_v35  ;;  %v897_v5 = vcombine.low %v846_v50, %v862_v54  ;;  %v872_v6 = vcombine.low %v842_v57, %v858_v59  ;;  %v1124_v48 = vsub.f32 1.0, %v1123_v47 }
 0x23b   : > { %v905_v7 = vcombine.low %v854_v58, %v870_v62  ;;  %v504_v10 = vshrl.u32 %v466_v60, 16  ;;  %v887_v14 = vrot.slane %v880_v1, %v2251_v31  ;;  %v1129_v50 = vsub.s32 0, %v2248_v28 }
 0x23c   : > { %v491_v2 = vcombine.high %v490_v61, %v2026_v46  ;;  %v494_v3 = vpack.i.b16 %v490_v61, %v465_v49  ;;  %v497_v4 = vshrl.u32 %v490_v61, 16  ;;  %v904_v15 = vrot.slane %v897_v5, %v2251_v31 }
 0x23d   : > { %v912_v11 = vrot.slane %v905_v7, %v2251_v31  ;;  %v879_v16 = vrot.slane %v872_v6, %v2251_v31  ;;  %v1125_v49 = vmul.f32 10000.0, %v1124_v48 }
 0x23e   : > { %v498_v8 = vpack.i.b16 %v497_v4, %v496_v63  ;;  %v502_v9 = vpack.i.b16 %v491_v2, %v466_v60  ;;  %v505_v12 = vshrl.u32 %v491_v2, 16  ;;  %509 = vst.msk [vmem:[#allocation2] sm:$0xf] %vm508_vm2, %v494_v3 }
 0x23f   : > { %v913_v17 = vcombine.low %v904_v15, %v912_v11  ;;  %v888_v18 = vcombine.low %v879_v16, %v887_v14  ;;  %v1130_v51 = vrot.slane %v1125_v49, %v1129_v50 }
 0x240   : > { %v506_v13 = vpack.i.b16 %v505_v12, %v504_v10  ;;  %510 = vst.msk [vmem:[#allocation2 + $0x4] sm:$0xf] %vm508_vm2, %v498_v8  ;;  %511 = vst.msk [vmem:[#allocation2 + $0x8] sm:$0xf] %vm508_vm2, %v502_v9 }
 0x241   : > { %v920_v22 = vrot.slane %v913_v17, %v2258_v35  ;;  %v895_v25 = vrot.slane %v888_v18, %v2258_v35 }
 0x242   : > { %512 = vst.msk [vmem:[#allocation2 + $0xc] sm:$0xf] %vm508_vm2, %v506_v13 }
 0x243   : > { %v926_v26 = vshrl.u32 %v920_v22, 16  ;;  %v924_v29 = vpack.i.b16 %v920_v22, %v895_v25  ;;  %v925_v30 = vshrl.u32 %v895_v25, 16  ;;  %v921_v38 = vcombine.high %v920_v22, %v2026_v46 }
 0x244   : > { %v896_v40 = vcombine.high %v895_v25, %v2026_v46 }
 0x245   : > { %v934_v19 = vld [vmem:[#allocation2] sm:$0xf]  ;;  %v927_v37 = vpack.i.b16 %v926_v26, %v925_v30  ;;  %v932_v42 = vshrl.u32 %v921_v38, 16 }
 0x246   : > { %v943_v20 = vsel %vm938_vm3, %v934_v19, 0  ;;  %v930_v43 = vpack.i.b16 %v921_v38, %v896_v40  ;;  %v931_v44 = vshrl.u32 %v896_v40, 16 }
 0x247   : > { %1714 = vmatpush3.bf16.xpose.msra.mxu0 %v943_v20  ;;  %v935_v23 = vld [vmem:[#allocation2 + $0x4] sm:$0xf]  ;;  %v936_v27 = vld [vmem:[#allocation2 + $0x8] sm:$0xf] }
 0x248   : > { %v989_v24 = vsel %vm938_vm3, %v935_v23, 0  ;;  %1725 = vmatprep.subr.bf16.mxu0 %v2018_v0  ;;  %v1035_v36 = vsel %vm938_vm3, %v936_v27, 0  ;;  %v933_v45 = vpack.i.b16 %v932_v42, %v931_v44 }
 0x249   : > { %1720 = vmatpush3.bf16.xpose.msra.mxu1 %v989_v24  ;;  %v937_v32 = vld [vmem:[#allocation2 + $0xc] sm:$0xf] }
 0x24a   : > { %1731 = vmatprep.subr.bf16.mxu1 %v2018_v0  ;;  %v1081_v39 = vsel %vm938_vm3, %v937_v32, 0 }
 0x24e   : > { %1716 = vmatmul.mubr.msk.bf16.vlgmr.msra.gmra.mrb[4].mxu0 %vm938_vm3, %v924_v29 }
 0x24f   : > { %1726 = vmatpush3.bf16.xpose.msra.mxu0 %v1035_v36  ;;  %1727 = vmatprep.mubr.msk.bf16.mxu0 %vm2019_vm0, %v2018_v0 }
 0x250   : > { %1722 = vmatmul.mubr.msk.bf16.vlgmr.msra.gmra.mrb[4].mxu1 %vm938_vm3, %v927_v37  ;;  %1737 = vmatprep.subr.bf16.mxu0 %v2018_v0 }
 0x251   : > { %1732 = vmatpush3.bf16.xpose.msra.mxu1 %v1081_v39  ;;  %1733 = vmatprep.mubr.msk.bf16.mxu1 %vm2019_vm0, %v2018_v0 }
 0x252   : > { %1743 = vmatprep.subr.bf16.mxu1 %v2018_v0 }
 0x256   : > { %1728 = vmatmul.mubr.msk.bf16.vlgmr.msra.gmra.mrb[8].mxu0 %vm938_vm3, %v930_v43 }
 0x257   : > { %1739 = vmatprep.mubr.msk.bf16.mxu0 %vm2019_vm0, %v2018_v0 }
 0x258   : > { %1734 = vmatmul.mubr.msk.bf16.vlgmr.msra.gmra.mrb[8].mxu1 %vm938_vm3, %v933_v45 }
 0x259   : > { %1745 = vmatprep.mubr.msk.bf16.mxu1 %vm2019_vm0, %v2018_v0 }
 0x321   : > { %v979_v52 = vpop.f32.mrb[4].mxu0 }
 0x322   : > { %v1132_v53 = vsub.f32 %v979_v52, %v1130_v51  ;;  %v1717_v54 = vpop.f32.mrb[5].mxu0 }
 0x323   : > { %v982_v55 = vpop.f32.mrb[6].mxu0  ;;  %v1025_v56 = vpop.f32.mrb[4].mxu1 }
 0x324   : > { %v1133_v57 = vsub.f32 %v1025_v56, %v1130_v51  ;;  %v1718_v58 = vpop.f32.mrb[7].mxu0  ;;  %v1723_v59 = vpop.f32.mrb[5].mxu1  ;;  %v1136_v60 = vsel %vm938_vm3, %v1132_v53, -inf }
 0x325   : > { %v1028_v61 = vpop.f32.mrb[6].mxu1  ;;  %1137 = vmax.xlane.f32.xlu1 %v1136_v60 }
 0x326   : > { %v1724_v62 = vpop.f32.mrb[7].mxu1  ;;  %v1139_v63 = vsel %vm938_vm3, %v1133_v57, -inf }
 0x327   : > { %1140 = vmax.xlane.f32.xlu0 %v1139_v63 }
 0x329   : > { %v1071_v1 = vpop.f32.mrb[8].mxu0 }
 0x32a   : > { %v1134_v2 = vsub.f32 %v1071_v1, %v1130_v51  ;;  %v1729_v28 = vpop.f32.mrb[9].mxu0 }
 0x32b   : > { %v1074_v3 = vpop.f32.mrb[10].mxu0  ;;  %v1117_v4 = vpop.f32.mrb[8].mxu1 }
 0x32c   : > { %v1135_v5 = vsub.f32 %v1117_v4, %v1130_v51  ;;  %v1730_v6 = vpop.f32.mrb[11].mxu0  ;;  %v1735_v7 = vpop.f32.mrb[9].mxu1  ;;  %v1142_v8 = vsel %vm938_vm3, %v1134_v2, -inf }
 0x32d   : > { %v1120_v9 = vpop.f32.mrb[10].mxu1  ;;  %1143 = vmax.xlane.f32.xlu0 %v1142_v8 }
 0x32e   : > { %v1736_v10 = vpop.f32.mrb[11].mxu1  ;;  %v1145_v12 = vsel %vm938_vm3, %v1135_v5, -inf }
 0x32f   : > { %1146 = vmax.xlane.f32.xlu1 %v1145_v12 }
 0x340   : > { %515 = vrot.lane.b32.xlu1 %v2255_v34, %s2020_s25 }
 0x343   : > { %513 = vrot.lane.b32.xlu0 %v2243_v21, %s2020_s25 }
 0x344   : > { %517 = vrot.lane.b32.xlu1 %v2253_v33, %s2020_s25 }
 0x347   : > { %519 = vrot.lane.b32.xlu0 %v2264_v41, %s2020_s25  ;;  %s252_s25 = scalar_lea.vmem [#allocation9], %s1652_s11 }
 0x348   : > { %s1542_s23 = sshll.u32 %s252_s25, 4  ;;  %s2430_s23 = int_to_ptr.vmem [resolvable:$true] %s1542_s23 }
 0x349   : > { %s1926_s18 = scalar_lea.vmem %s2430_s23, 128  ;;  %p1933_p11 = scmp.lt.s32.totalorder %s2430_s23, %s1931_s12 }
 0x34a   : > { %p1927_p6 = scmp.ne.s32.totalorder %s2430_s23, %s1926_s18  ;;  %p1934_p0 = scmp.lt.s32.totalorder %s1932_s29, %s1926_s18 }
 0x34c   : > { %p1928_p8 = pnand %p1927_p6, %p2152_p10  ;;  %p1935_p5 = por %p1934_p0, %p1933_p11 }
 0x34e   : > { %p1929_p12 = pneg %p1928_p8 }
 0x350   : > { %p1936_p9 = pnand %p1935_p5, %p1929_p12 }
 0x3b2   : > { %v1138_v11 = vpop.xlane.xlu1 %1137 }
 0x3b3   : > { %v1148_v13 = vsub.f32 %v1132_v53, %v1138_v11 }
 0x3b4   : > { %v1141_v14 = vpop.xlane.xlu0 %1140 }
 0x3b5   : > { %v1152_v15 = vmul.f32 1.442695, %v1148_v13  ;;  %v1149_v16 = vsub.f32 %v1133_v57, %v1141_v14 }
 0x3b7   : > { %1852 = vpow2.f32 %v1152_v15  ;;  %v1154_v17 = vmul.f32 1.442695, %v1149_v16 }
 0x3b9   : > { %1854 = vpow2.f32 %v1154_v17 }
 0x3ba   : > { %v1144_v18 = vpop.xlane.xlu0 %1143 }
 0x3bb   : > { %v1150_v19 = vsub.f32 %v1134_v2, %v1144_v18 }
 0x3bc   : > { %v1147_v34 = vpop.xlane.xlu1 %1146 }
 0x3bd   : > { %v1156_v20 = vmul.f32 1.442695, %v1150_v19  ;;  %v1151_v22 = vsub.f32 %v1135_v5, %v1147_v34 }
 0x3be   : > { %v514_v21 = vpop.permute.xlu0 %513 }
 0x3bf   : > { %1856 = vpow2.f32 %v1156_v20  ;;  %v1158_v23 = vmul.f32 1.442695, %v1151_v22  ;;  %v528_v36 = vrot.slane %v514_v21, %v2251_v31 }
 0x3c0   : > { %v516_v33 = vpop.permute.xlu1 %515 }
 0x3c1   : > { %v2348_v24 = vpop.eup %1852  ;;  %1858 = vpow2.f32 %v1158_v23  ;;  %v562_v27 = vrot.slane %v516_v33, %v2251_v31 }
 0x3c2   : > { %v520_v41 = vpop.permute.xlu0 %519  ;;  %v1160_v25 = vsel %vm938_vm3, %v2348_v24, 0.0 }
 0x3c3   : > { %v2352_v26 = vpop.eup %1854  ;;  %v570_v29 = vrot.slane %v520_v41, %v2251_v31  ;;  %1161 = vadd.xlane.f32.xlu1 %v1160_v25 }
 0x3c4   : > { %v518_v30 = vpop.permute.xlu1 %517  ;;  %v1163_v32 = vsel %vm938_vm3, %v2352_v26, 0.0 }
 0x3c5   : > { %v571_v37 = vcombine.low %v562_v27, %v570_v29  ;;  %v572_v38 = vcombine.high %v562_v27, %v570_v29  ;;  %v536_v39 = vrot.slane %v518_v30, %v2251_v31  ;;  %1164 = vadd.xlane.f32.xlu0 %v1163_v32 }
 0x3c7   : > { %v579_v40 = vrot.slane %v571_v37, %v2258_v35  ;;  %v586_v42 = vrot.slane %v572_v38, %v2258_v35  ;;  %v537_v43 = vcombine.low %v528_v36, %v536_v39  ;;  %v538_v44 = vcombine.high %v528_v36, %v536_v39 }
 0x3c9   : > { %v2362_v45 = vpop.eup %1856  ;;  %v587_v47 = vcombine.high %v579_v40, %v2026_v46  ;;  %v545_v48 = vrot.slane %v537_v43, %v2258_v35  ;;  %v552_v49 = vrot.slane %v538_v44, %v2258_v35  ;;  %v588_v52 = vcombine.high %v586_v42, %v2026_v46 }
 0x3ca   : > { %v1166_v50 = vsel %vm938_vm3, %v2362_v45, 0.0  ;;  %v594_v53 = vshrl.u32 %v579_v40, 16  ;;  %v610_v54 = vshrl.u32 %v586_v42, 16 }
 0x3cb   : > { %v2369_v51 = vpop.eup %1858  ;;  %1167 = vadd.xlane.f32.xlu0 %v1166_v50  ;;  %v553_v55 = vcombine.high %v545_v48, %v2026_v46  ;;  %v554_v56 = vcombine.high %v552_v49, %v2026_v46  ;;  %v591_v57 = vpack.i.b16 %v579_v40, %v545_v48  ;;  %v593_v58 = vshrl.u32 %v545_v48, 16 }
 0x3cc   : > { %v602_v59 = vshrl.u32 %v587_v47, 16  ;;  %v607_v60 = vpack.i.b16 %v586_v42, %v552_v49  ;;  %v609_v61 = vshrl.u32 %v552_v49, 16  ;;  %v1169_v62 = vsel %vm938_vm3, %v2369_v51, 0.0 }
 0x3cd   : > { %v595_v63 = vpack.i.b16 %v594_v53, %v593_v58  ;;  %v599_v1 = vpack.i.b16 %v587_v47, %v553_v55  ;;  %v601_v2 = vshrl.u32 %v553_v55, 16  ;;  %v615_v28 = vpack.i.b16 %v588_v52, %v554_v56  ;;  %1170 = vadd.xlane.f32.xlu1 %v1169_v62 }
 0x3ce   : > { %v618_v3 = vshrl.u32 %v588_v52, 16  ;;  %v611_v4 = vpack.i.b16 %v610_v54, %v609_v61  ;;  %v617_v5 = vshrl.u32 %v554_v56, 16  ;;  %v621_v6 = vcombine.low %v591_v57, %v607_v60 }
 0x3cf   : > { %v603_v7 = vpack.i.b16 %v602_v59, %v601_v2  ;;  %v629_v8 = vcombine.low %v599_v1, %v615_v28 }
 0x3d0   : > { %v619_v9 = vpack.i.b16 %v618_v3, %v617_v5  ;;  %v646_v10 = vcombine.low %v595_v63, %v611_v4  ;;  %v628_v12 = vrot.slane %v621_v6, %v2251_v31 }
 0x3d1   : > { %v636_v11 = vrot.slane %v629_v8, %v2251_v31 }
 0x3d2   : > { %v654_v13 = vcombine.low %v603_v7, %v619_v9  ;;  %v653_v15 = vrot.slane %v646_v10, %v2251_v31 }
 0x3d3   : > { %v637_v14 = vcombine.low %v628_v12, %v636_v11 }
 0x3d4   : > { %v661_v16 = vrot.slane %v654_v13, %v2251_v31 }
 0x3d5   : > { %v644_v17 = vrot.slane %v637_v14, %v2258_v35 }
 0x3d6   : > { %v662_v18 = vcombine.low %v653_v15, %v661_v16 }
 0x3d7   : > { %v645_v19 = vcombine.high %v644_v17, %v2026_v46  ;;  %v675_v21 = vshrl.u32 %v644_v17, 16 }
 0x3d8   : > { %v669_v34 = vrot.slane %v662_v18, %v2258_v35 }
 0x3d9   : > { %v683_v25 = vshrl.u32 %v645_v19, 16 }
 0x3da   : > { %v670_v20 = vcombine.high %v669_v34, %v2026_v46  ;;  %v673_v22 = vpack.i.b16 %v669_v34, %v644_v17  ;;  %v676_v23 = vshrl.u32 %v669_v34, 16 }
 0x3dc   : > { %v677_v33 = vpack.i.b16 %v676_v23, %v675_v21  ;;  %v681_v41 = vpack.i.b16 %v670_v20, %v645_v19  ;;  %v684_v27 = vshrl.u32 %v670_v20, 16  ;;  %687 = vst.msk [vmem:[#allocation3] sm:$0xf] %vm508_vm2, %v673_v22 }
 0x3de   : > { %v685_v29 = vpack.i.b16 %v684_v27, %v683_v25  ;;  %688 = vst.msk [vmem:[#allocation3 + $0x4] sm:$0xf] %vm508_vm2, %v677_v33  ;;  %689 = vst.msk [vmem:[#allocation3 + $0x8] sm:$0xf] %vm508_vm2, %v681_v41 }
 0x3e0   : > { %690 = vst.msk [vmem:[#allocation3 + $0xc] sm:$0xf] %vm508_vm2, %v685_v29 }
 0x3e3   : > { %v1184_v30 = vld [vmem:[#allocation3] sm:$0xf] }
 0x3e4   : > { %v1193_v46 = vsel %vm1191_vm4, %v1184_v30, 0 }
 0x3e5   : > { %1738 = vmatpush3.bf16.msra.mxu0 %v1193_v46  ;;  %v1185_v32 = vld [vmem:[#allocation3 + $0x4] sm:$0xf]  ;;  %v1186_v47 = vld [vmem:[#allocation3 + $0x8] sm:$0xf] }
 0x3e6   : > { %v1239_v36 = vsel %vm1191_vm4, %v1185_v32, 0  ;;  %1749 = vmatprep.subr.bf16.mxu0 %v2018_v0  ;;  %v1285_v52 = vsel %vm1191_vm4, %v1186_v47, 0 }
 0x3e7   : > { %1744 = vmatpush3.bf16.msra.mxu1 %v1239_v36  ;;  %v1187_v50 = vld [vmem:[#allocation3 + $0xc] sm:$0xf] }
 0x3e8   : > { %1755 = vmatprep.subr.bf16.mxu1 %v2018_v0 }
 0x450   : > { %v1162_v37 = vpop.xlane.xlu1 %1161 }
 0x451   : > { %1860 = vrcp.f32 %v1162_v37 }
 0x452   : > { %v1165_v38 = vpop.xlane.xlu0 %1164 }
 0x453   : > { %1862 = vrcp.f32 %v1165_v38 }
 0x458   : > { %v1168_v39 = vpop.xlane.xlu0 %1167 }
 0x459   : > { %1864 = vrcp.f32 %v1168_v39 }
 0x45a   : > { %v1171_v42 = vpop.xlane.xlu1 %1170 }
 0x45b   : > { %v1861_v40 = vpop.eup %1860  ;;  %1866 = vrcp.f32 %v1171_v42 }
 0x45c   : > { %v1176_v43 = vmul.f32 %v1861_v40, %v2348_v24  ;;  %v1331_v24 = vsel %vm1191_vm4, %v1187_v50, 0 }
 0x45d   : > { %v1863_v44 = vpop.eup %1862 }
 0x45e   : > { %v1177_v48 = vmul.f32 %v1863_v44, %v2352_v26  ;;  %v1180_v49 = vpack.c.bf16 %v1176_v43, %v1176_v43 }
 0x460   : > { %1740 = vmatmul.mubr.msk.bf16.vlgmr.msra.gmra.mrb[12].mxu0 %vm938_vm3, %v1180_v49  ;;  %v1181_v53 = vpack.c.bf16 %v1177_v48, %v1177_v48 }
 0x461   : > { %1750 = vmatpush3.bf16.msra.mxu0 %v1285_v52  ;;  %1751 = vmatprep.mubr.msk.bf16.mxu0 %vm2019_vm0, %v2018_v0 }
 0x462   : > { %1746 = vmatmul.mubr.msk.bf16.vlgmr.msra.gmra.mrb[12].mxu1 %vm938_vm3, %v1181_v53 }
 0x463   : > { %v1865_v54 = vpop.eup %1864  ;;  %1756 = vmatpush3.bf16.msra.mxu1 %v1331_v24  ;;  %1757 = vmatprep.mubr.msk.bf16.mxu1 %vm2019_vm0, %v2018_v0 }
 0x464   : > { %v1178_v26 = vmul.f32 %v1865_v54, %v2362_v45 }
 0x465   : > { %v1867_v55 = vpop.eup %1866 }
 0x466   : > { %v1182_v56 = vpack.c.bf16 %v1178_v26, %v1178_v26  ;;  %v1179_v57 = vmul.f32 %v1867_v55, %v2369_v51 }
 0x468   : > { %1752 = vmatmul.mubr.msk.bf16.vlgmr.msra.gmra.mrb[16].mxu0 %vm938_vm3, %v1182_v56  ;;  %v1183_v58 = vpack.c.bf16 %v1179_v57, %v1179_v57 }
 0x46a   : > { %1758 = vmatmul.mubr.msk.bf16.vlgmr.msra.gmra.mrb[16].mxu1 %vm938_vm3, %v1183_v58 }
 0x533   : > { %v1229_v59 = vpop.f32.mrb[12].mxu0 }
 0x534   : > { %v1741_v60 = vpop.f32.mrb[13].mxu0 }
 0x535   : > { %v1232_v61 = vpop.f32.mrb[14].mxu0  ;;  %v1275_v62 = vpop.f32.mrb[12].mxu1 }
 0x536   : > { %v1742_v63 = vpop.f32.mrb[15].mxu0  ;;  %v1747_v1 = vpop.f32.mrb[13].mxu1 }
 0x537   : > { %v1278_v2 = vpop.f32.mrb[14].mxu1 }
 0x538   : > { %v1748_v28 = vpop.f32.mrb[15].mxu1 }
 0x53b   : > { %v1321_v0 = vpop.f32.mrb[16].mxu0 }
 0x53c   : > { %v1373_v3 = vcombine.low %v1229_v59, %v1321_v0  ;;  %v1374_v45 = vcombine.high %v1229_v59, %v1321_v0  ;;  %v1753_v4 = vpop.f32.mrb[17].mxu0 }
 0x53d   : > { %v1324_v5 = vpop.f32.mrb[18].mxu0  ;;  %v1367_v6 = vpop.f32.mrb[16].mxu1 }
 0x53e   : > { %v1754_v51 = vpop.f32.mrb[19].mxu0  ;;  %v1389_v7 = vcombine.low %v1275_v62, %v1367_v6  ;;  %v1390_v8 = vcombine.high %v1275_v62, %v1367_v6  ;;  %v1759_v9 = vpop.f32.mrb[17].mxu1  ;;  %v1381_v12 = vrot.slane %v1373_v3, %v2251_v31  ;;  %v1388_v11 = vrot.slane %v1374_v45, %v2251_v31 }
 0x53f   : > { %v1370_v10 = vpop.f32.mrb[18].mxu1 }
 0x540   : > { %v1397_v13 = vrot.slane %v1389_v7, %v2251_v31  ;;  %v1404_v14 = vrot.slane %v1390_v8, %v2251_v31  ;;  %v1760_v15 = vpop.f32.mrb[19].mxu1 }
 0x542   : > { %v1405_v16 = vcombine.low %v1381_v12, %v1397_v13  ;;  %v1406_v17 = vcombine.high %v1381_v12, %v1397_v13  ;;  %v1421_v18 = vcombine.low %v1388_v11, %v1404_v14  ;;  %v1422_v19 = vcombine.high %v1388_v11, %v1404_v14 }
 0x544   : > { %v1413_v34 = vrot.slane %v1405_v16, %v2258_v35  ;;  %v1420_v20 = vrot.slane %v1406_v17, %v2258_v35  ;;  %v1429_v22 = vrot.slane %v1421_v18, %v2258_v35  ;;  %v1436_v21 = vrot.slane %v1422_v19, %v2258_v35 }
 0x546   : > { %v1441_v23 = vcombine.low %v1413_v34, %v1420_v20  ;;  %v1669_v33 = vcombine.high %v1413_v34, %v1420_v20  ;;  %v1457_v41 = vcombine.low %v1429_v22, %v1436_v21  ;;  %v1670_v25 = vcombine.high %v1429_v22, %v1436_v21 }
 0x548   : > { %v1448_v27 = vrot.slane %v1441_v23, %v2251_v31  ;;  %v1456_v29 = vrot.slane %v1669_v33, %v2251_v31  ;;  %v1464_v30 = vrot.slane %v1457_v41, %v2251_v31  ;;  %v1472_v46 = vrot.slane %v1670_v25, %v2251_v31 }
 0x54a   : > { %v1474_v32 = vcombine.high %v1448_v27, %v1456_v29  ;;  %v1490_v36 = vcombine.high %v1464_v30, %v1472_v46  ;;  %v1473_v37 = vcombine.low %v1448_v27, %v1456_v29  ;;  %v1489_v38 = vcombine.low %v1464_v30, %v1472_v46 }
 0x54c   : > { %v1488_v39 = vrot.slane %v1474_v32, %v2258_v35  ;;  %v1504_v40 = vrot.slane %v1490_v36, %v2258_v35  ;;  %v1481_v42 = vrot.slane %v1473_v37, %v2258_v35  ;;  %v1497_v43 = vrot.slane %v1489_v38, %v2258_v35 }
 0x54e   : > { %v1507_v44 = vcombine.low %v1488_v39, %v1504_v40  ;;  %v1506_v47 = vcombine.high %v1481_v42, %v1497_v43  ;;  %v1508_v48 = vcombine.high %v1488_v39, %v1504_v40  ;;  %v1505_v49 = vcombine.low %v1481_v42, %v1497_v43 }
 0x550   : > { %1514 = vrot.lane.b32.xlu1 %v1507_v44, %s2027_s24  ;;  %1510 = vrot.lane.b32.xlu0 %v1506_v47, %s2028_s30 }
 0x554   : > { %1518 = vrot.lane.b32.xlu1 %v1508_v48, %s2029_s9 }
 0x5c2   : > { %v1515_v31 = vpop.permute.xlu1 %1514  ;;  %v1511_v50 = vpop.permute.xlu0 %1510 }
 0x5c3   : > { %v1521_v52 = vsel %vm938_vm3, %v1505_v49, %v1511_v50 }
 0x5c4   : > { %v1523_v53 = vsel %vm1522_vm5, %v1521_v52, %v1515_v31 }
 0x5c6   : > { %v1519_v35 = vpop.permute.xlu1 %1518 }
 0x5c7   : > { %v1525_v24 = vsel %vm1524_vm6, %v1523_v53, %v1519_v35 }
 0x5c8   : > { %1526 = vst.msk [vmem:[%s252_s25] sm:$0xff] %vm291_vm1, %v1525_v24 }
 0x5c9   : > { %1939 = shalt.err (!%p1936_p9)
}
 0x5ca   : > { %s1940_s6 = scalar_lea.hbm %s2428_s21, 128  ;;  %s1944_s30 = scalar_lea.hbm %s2482_s4, 256 }
 0x5cb   : > { %p1941_p1 = scmp.ne.s32.totalorder %s2428_s21, %s1940_s6  ;;  %p1945_p3 = scmp.lt.u32.totalorder %s2428_s21, %s2482_s4 }
 0x5cc   : > { %p1946_p13 = scmp.lt.u32.totalorder %s1944_s30, %s1940_s6  ;;  %p1948_p6 = scmp.lt.u32.totalorder %s1940_s6, %s2428_s21 }
 0x5cd   : > { %p1942_p2 = pnand %p1941_p1, %p2152_p10 }
 0x5ce   : > { %p1947_p4 = por %p1946_p13, %p1945_p3 }
 0x5cf   : > { %p1943_p7 = pneg %p1942_p2 }
 0x5d0   : > { %p1949_p8 = por %p1948_p6, %p1947_p4 }
 0x5d2   : > { %p1950_p12 = pnand %p1949_p8, %p1943_p7 }
 0x5d4   : > { %1953 = shalt.err (!%p1950_p12)
}
 0x5d5   : > { %1767 = dma.vmem_to_hbm [thread:$0]  (%p2152_p10), %s2430_s23, 128, %s2428_s21, %s1528_s22  }
 0x5d6 PF: > { %s1554_s7 = sand.u32 1, %s1992_s15   ;;  %p2500_p11 = scmp.ne.s32.totalorder %s2490_s26, 0 }
 0x5d7   : > { %p2501_p0 = scmp.ge.s32.totalorder %s2012_s20, 2  ;;  %s1555_s25 = scalar_lea.sflag [#allocation6], %s1554_s7 }
 0x5d9   : > { %p1778_p5 = pnand %p2501_p0, %p2500_p11 }
 0x5db   : > { %1987 = dma.done.wait (!%p1778_p5), %s1555_s25, 128  }
 0x5dc   : > { %1989 = vsyncadd (!%p1778_p5), %s1555_s25, 4294967168  ;;  %s21_s20 = sadd.s32 1, %s2012_s20   ;;  %s2502_s15 = smov %s1996_s16 }
 0x5dd   : > { %p18_p9 = scmp.ge.s32.totalorder %s21_s20, 4   ;;  %s2503_s16 = smov %s2000_s17 }
 0x5de   : > { %s2504_s17 = smov %s2161_s10  ;;  %s2505_s18 = smov %s2008_s19 }
 0x5df   : > { %s2506_s19 = smov %s2508_s5  ;;  %20 = sbr.rel (!%p18_p9) target bundleno = 7 (0x7), region = 93 }
 0x5e6   :  { %1560 = vsyncpa [#allocation5], 1 }
 0x5e7   :  { %1562 = vsyncpa [#allocation5 + $0x1], 1 }
 0x5e8   :  { %1563 = vsyncpa [#allocation8], 1 }
 0x5e9   :  { %1564 = vsyncpa [#allocation6], 1 }
 0x5ea   :  { %1566 = vsyncpa [#allocation6 + $0x1], 1 }

// kernel: tpu_custom_call.1
= control target key start
LH: loop header
LB: loop body
LE: loop exit
PB: predicated region body
PF: predicated region fallthrough
CT: control target
= control target key end

     0   :  { %9 = vsyncpa [#allocation5], 0  ;;  %s2478_s0 = inlined_call_operand.hbm [shape: bf16[2,8,32], index: 0, kind: input, shape index: {}]   ;;  %s2479_s1 = inlined_call_operand.hbm [shape: bf16[32,96], index: 1, kind: input, shape index: {}]   ;;  %s2480_s2 = inlined_call_operand.vmem [shape: f32[1,96], index: 2, kind: input, shape index: {}]   ;;  %s2481_s3 = inlined_call_operand.vmem [shape: f32[2,1,8], index: 3, kind: input, shape index: {}]   ;;  %s2482_s4 = inlined_call_operand.hbm [shape: f32[2,8,32], index: 4, kind: output, shape index: {}]  }
   0x1   :  { %11 = vsyncpa [#allocation5 + $0x1], 0 }
   0x2   :  { %12 = vsyncpa [#allocation8], 0 }
   0x3   :  { %13 = vsyncpa [#allocation6], 0 }
   0x4   :  { %15 = vsyncpa [#allocation6 + $0x1], 0  ;;  %s2056_s15 = smov 0   ;;  %s2058_s16 = smov 0  }
   0x5   :  { %s2060_s17 = smov 0   ;;  %s2062_s18 = smov 0  }
   0x6   :  { %s2064_s19 = smov 0   ;;  %s2066_s20 = smov 0  }
   0x7 LB: > { %s1642_s21 = sadd.s32 4294967295, %s2012_s20   ;;  %s1643_s22 = sadd.s32 4294967294, %s2012_s20   ;;  %s2012_s20 = sphi %s2066_s20, %s21_s20   ;;  %s2008_s19 = sphi %s2064_s19, %s2506_s19   ;;  %s2004_s18 = sphi %s2062_s18, %s2505_s18   ;;  %s2000_s17 = sphi %s2060_s17, %s2504_s17   ;;  %s1996_s16 = sphi %s2058_s16, %s2503_s16   ;;  %s1992_s15 = sphi %s2056_s15, %s2502_s15  }
   0x8   : > { %p53_p0 = scmp.ne.s32.totalorder %s1996_s16, %s1992_s15  ;;  %p2090_p1 = scmp.eq.s32.totalorder %s1642_s21, 0 }
   0x9   : > { %p2094_p2 = scmp.eq.s32.totalorder %s1642_s21, 1  ;;  %p153_p3 = scmp.eq.s32.totalorder %s1643_s22, 1 }
   0xa   : > { %s2487_s23 = scalar_select %p2090_p1, 1, 0 }
   0xb   : > { %s2488_s24 = scalar_select %p2094_p2, 1, 0 }
   0xc   : > { %p2100_p4 = por %p2090_p1, %p53_p0  ;;  %p1644_p5 = scmp.ge.s32.totalorder %s2012_s20, 1 }
   0xd   : > { %p2105_p6 = por %p153_p3, %p53_p0  ;;  %p160_p7 = scmp.lt.s32.totalorder %s2012_s20, 3 }
   0xe   : > { %s2489_s25 = scalar_select %p2100_p4, 1, 0 }
   0xf   : > { %s2490_s26 = scalar_select %p2105_p6, 1, 0 }
  0x10   : > { %p2110_p8 = pnand %p1644_p5, %p160_p7  ;;  %s2014_s28 = smov [#allocation7]  }
  0x11   : > { %s172_s29 = sshll.u32 %s2014_s28, 4  ;;  %s33_s5 = sadd.s32 1, %s2008_s19  ;;  %s173_s29 = int_to_ptr.vmem [resolvable:$true] %s172_s29 }
  0x12   : > { %s2491_s27 = scalar_select %p2110_p8, 1, 0 }
  0x13   : > { %p1769_p9 = pneg %p2110_p8  ;;  %s1868_s8 = scalar_lea.hbm %s2479_s1, 256 }
  0x14   : > { %p1869_p12 = scmp.ne.s32.totalorder %s2479_s1, %s1868_s8  ;;  %p1875_p5 = scmp.lt.u32.totalorder %s1868_s8, %s2479_s1 }
  0x15   : > { %p2119_p11 = pnand %p1769_p9, %p2090_p1 }
  0x17   : > { %p1870_p13 = pneg %p2119_p11 }
  0x19   : > { %p1871_p0 = pnand %p1870_p13, %p1869_p12 }
  0x1b   : > { %p1872_p3 = pneg %p1871_p0 }
  0x1d   : > { %p1877_p7 = pnand %p1875_p5, %p1872_p3 }
  0x1f   : > { %1880 = shalt.err (!%p1877_p7)
}
  0x20   : > { %s1881_s13 = scalar_lea.vmem %s173_s29, 256  ;;  %p1889_p1 = scmp.lt.s32.totalorder %s173_s29, %s173_s29 }
  0x21   : > { %p1882_p9 = scmp.ne.s32.totalorder %s173_s29, %s1881_s13  ;;  %p1890_p4 = scmp.lt.s32.totalorder %s1881_s13, %s1881_s13 }
  0x23   : > { %p1884_p10 = pnand %p1882_p9, %p1870_p13  ;;  %p1891_p8 = por %p1890_p4, %p1889_p1 }
  0x25   : > { %p1885_p6 = pneg %p1884_p10 }
  0x27   : > { %p1892_p2 = pnand %p1891_p8, %p1885_p6 }
  0x29   : > { %1895 = shalt.err (!%p1892_p2)
}
  0x2a   : > { %s2015_s14 = smov 64   ;;  %s2016_s21 = smov 4  }
  0x2b   : > { %1772 = dma.hbm_to_vmem [thread:$0]  (!%p2119_p11), %s2479_s1, 256, %s173_s29, [#allocation8], %s2015_s14, %s2015_s14, %s2016_s21  }
  0x2c   : > { %p35_p1 = scmp.ge.s32.totalorder %s33_s5, 2  ;;  %s40_s6 = sadd.s32 1, %s2000_s17 }
  0x2d   : > { %p47_p2 = scmp.ne.s32.totalorder %s2000_s17, %s1996_s16  ;;  %p48_p4 = scmp.eq.s32.totalorder %s2012_s20, 0 }
  0x2e   : > { %s2508_s5 = smov (%p35_p1, %s33_s5), 0  ;;  %p2494_p8 = scmp.ne.s32.totalorder %s2488_s24, 0 }
  0x2f   : > { %p2146_p6 = por %p48_p4, %p47_p2  ;;  %s37_s30 = ssub.s32 %s2008_s19, %s2508_s5 }
  0x30   : > { %p2152_p10 = por %p2494_p8, %p47_p2  ;;  %p1782_p12 = scmp.lt.s32.totalorder %s2012_s20, 2 }
  0x31   : > { %p38_p11 = scmp.eq.s32.totalorder %s37_s30, 0  ;;  %s189_s29 = sand.u32 1, %s2000_s17  }
  0x32   : > { %s1647_s9 = sshll.u32 %s189_s29, 2  ;;  %s1648_s11 = sshll.u32 %s2008_s19, 6 }
  0x33   : > { %s2161_s10 = scalar_select %p38_p11, %s2000_s17, %s40_s6  }
  0x34   : > { %s2167_s14 = scalar_lea.hbm %s2478_s0, %s1648_s11  ;;  %s193_s24 = scalar_lea.vmem [#allocation4], %s1647_s9 }
  0x35   : > { %s200_s21 = sshll.u32 %s193_s24, 4  ;;  %p2173_p13 = pnand %p1782_p12, %p2146_p6  ;;  %s2169_s21 = int_to_ptr.vmem [resolvable:$true] %s200_s21 }
  0x36   : > { %s190_s28 = scalar_lea.sflag [#allocation5], %s189_s29  ;;  %s1896_s6 = scalar_lea.hbm %s2167_s14, 64 }
  0x37   : > { %p1897_p0 = scmp.ne.s32.totalorder %s2167_s14, %s1896_s6  ;;  %p1898_p3 = pneg %p2173_p13 }
  0x38   : > { %s1901_s11 = scalar_lea.hbm %s2478_s0, 128  ;;  %p1902_p9 = scmp.lt.u32.totalorder %s2167_s14, %s2478_s0 }
  0x39   : > { %p1899_p5 = pnand %p1898_p3, %p1897_p0  ;;  %p1903_p1 = scmp.lt.u32.totalorder %s1901_s11, %s1896_s6 }
  0x3a   : > { %p1905_p4 = scmp.lt.u32.totalorder %s1896_s6, %s2167_s14 }
  0x3b   : > { %p1900_p7 = pneg %p1899_p5  ;;  %p1904_p2 = por %p1903_p1, %p1902_p9 }
  0x3d   : > { %p1906_p6 = por %p1905_p4, %p1904_p2 }
  0x3f   : > { %p1907_p8 = pnand %p1906_p6, %p1900_p7 }
  0x41   : > { %1910 = shalt.err (!%p1907_p8)
}
  0x42   : > { %s1911_s29 = scalar_lea.vmem %s2169_s21, 64  ;;  %s2017_s13 = smov [#allocation4]  }
  0x43   : > { %p1912_p12 = scmp.ne.s32.totalorder %s2169_s21, %s1911_s29  ;;  %s1916_s24 = sshll.u32 %s2017_s13, 4  ;;  %s1917_s24 = int_to_ptr.vmem [resolvable:$false] %s1916_s24 }
  0x44   : > { %s1918_s30 = scalar_lea.vmem %s1917_s24, 128  ;;  %p1919_p5 = scmp.lt.s32.totalorder %s2169_s21, %s1917_s24 }
  0x45   : > { %p1914_p11 = pnand %p1912_p12, %p1898_p3  ;;  %p1920_p9 = scmp.lt.s32.totalorder %s1918_s30, %s1911_s29 }
  0x47   : > { %p1915_p0 = pneg %p1914_p11  ;;  %p1921_p1 = por %p1920_p9, %p1919_p5 }
  0x49   : > { %p1922_p2 = pnand %p1921_p1, %p1915_p0 }
  0x4b   : > { %1925 = shalt.err (!%p1922_p2)
}
  0x4c   : > { %1776 = dma.hbm_to_vmem [thread:$0]  (!%p2173_p13), %s2167_s14, 64, %s2169_s21, %s190_s28  }
  0x4d   : > { %p2497_p7 = scmp.ne.s32.totalorder %s2491_s27, 0 }
  0x4e   : > { %s2205_s6 = sand.u32 (!%p2497_p7), 1, %s1996_s16   ;;  %p2498_p3 = scmp.ne.s32.totalorder (!%p2497_p7), %s2489_s25, 0 }
  0x4f   : > { %215 = sbr.rel (%p2497_p7) target bundleno = 1494 (0x5d6), region = 36  ;;  %s1650_s9 = sshll.u32 (!%p2497_p7), %s2205_s6, 2 }
  0x50   : > { %s218_s11 = scalar_lea.sflag (!%p2497_p7), [#allocation5], %s2205_s6  ;;  %s2209_s7 = scalar_lea.vmem (!%p2497_p7), [#allocation4], %s1650_s9 }
  0x56   : > { %1979 = dma.done.wait (%p2498_p3), %s218_s11, 64  }
  0x57   : > { %1981 = vsyncadd (%p2498_p3), %s218_s11, 4294967232  ;;  %p2499_p13 = scmp.ne.s32.totalorder %s2487_s23, 0 }
  0x59   : > { %1983 = dma.done.wait (%p2499_p13), [#allocation8], 256  }
  0x5a   : > { %1985 = vsyncadd (%p2499_p13), [#allocation8], 4294967040  ;;  %v2018_v0 = vmov 0.0   ;;  %vm2019_vm0 = vmmov 0   ;;  %v1848_v1 = vld [vmem:[#allocation7] sm:$0xff]   ;;  %v1849_v2 = vld [vmem:[#allocation7 + $0x8] sm:$0xff]   ;;  %v346_v26 = vlaneseq }
  0x5b   : > { %1697 = vmatprep.subr.bf16.mxu0 %v2018_v0  ;;  %1705 = vmatprep.subr.bf16.mxu1 %v2018_v0  ;;  %s2020_s25 = smov 96   ;;  %v1850_v3 = vld [vmem:[#allocation7] sm:$0xff]   ;;  %v1851_v4 = vld [vmem:[#allocation7 + $0x8] sm:$0xff]   ;;  %v1653_v5 = vld [vmem:[%s2480_s2] ss:$0 sm:$0xff]  ;;  %vm291_vm1 = vcmask 261120  }
  0x5c   : > { %1701 = vmatprep.mubr.msk.bf16.mxu0 %vm2019_vm0, %v2018_v0  ;;  %1709 = vmatprep.mubr.msk.bf16.mxu1 %vm2019_vm0, %v2018_v0  ;;  %v696_v6 = vld [vmem:[%s2209_s7] sm:$0xf]  ;;  %s2021_s14 = smov 112   ;;  %s2022_s21 = smov 120   ;;  %v2024_v24 = vmov 1983009808  }
  0x5d   : > { %282 = vrot.lane.b32.xlu0 %v1848_v1, %s2020_s25  ;;  %1706 = vmatpush3.bf16.msra.mxu1 %v1850_v3  ;;  %v261_v9 = vld [vmem:[%s2209_s7] sm:$0xf]  ;;  %s2023_s22 = smov 104   ;;  %v344_v25 = vunpack.c.l.s4 %v2024_v24  ;;  %v2248_v28 = vshrl.u32 %v346_v26, 7  ;;  %v2025_v29 = vmov 1934713408  }
  0x5e   : > { %1707 = vmatprep.subr.bf16.mxu1 %v2018_v0  ;;  %288 = vrot.lane.b32.xlu1 %v1653_v5, %s2020_s25  ;;  %v361_v30 = vunpack.c.l.s4 %v2025_v29  ;;  %v2026_v46 = vmov 0   ;;  %vm508_vm2 = vcmask 60416   ;;  %vm938_vm3 = vcmask 64512   ;;  %p253_p4 = scmp.lt.s32.totalorder %s2004_s18, 1  ;;  %s2027_s24 = smov 16  }
  0x5f   : > { %v345_v27 = vunpack.c.0.s8 %v344_v25  ;;  %vm1191_vm4 = vcmask 1043456   ;;  %s2028_s30 = smov 8   ;;  %s2029_s9 = smov 24   ;;  %vm1522_vm5 = vcmask 130048   ;;  %vm1524_vm6 = vcmask 195584  }
  0x60   : > { %v362_v32 = vunpack.c.0.s8 %v361_v30  ;;  %s254_s28 = scalar_select %p253_p4, %s2004_s18, 1 }
  0x61   : > { %284 = vrot.lane.b32.xlu0 %v1849_v2, %s2020_s25  ;;  %1708 = vmatpush3.bf16.msra.mxu1 %v1851_v4  ;;  %v2251_v31 = vsub.s32 %v345_v27, %v2248_v28  ;;  %s1652_s11 = sshll.u32 %s2205_s6, 3  ;;  %s1672_s7 = sshll.u32 %s2004_s18, 7 }
  0x62   : > { %1719 = vmatprep.subr.bf16.mxu1 %v2018_v0  ;;  %v2258_v35 = vsub.s32 %v362_v32, %v2248_v28  ;;  %s255_s13 = scalar_lea.vmem %s2481_s3, %s254_s28  ;;  %s2030_s28 = smov [#allocation9]  }
  0x63   : > { %s1930_s12 = sshll.u32 %s2030_s28, 4  ;;  %s1931_s12 = int_to_ptr.vmem [resolvable:$false] %s1930_s12 }
  0x64   : > { %1710 = vmatmul.mubr.msk.bf16.vlgmr.msra.gmra.mrb[0].mxu1 %vm291_vm1, %v696_v6  ;;  %s1932_s29 = scalar_lea.vmem %s1931_s12, 256 }
  0x65   : > { %1721 = vmatprep.mubr.msk.bf16.mxu1 %vm2019_vm0, %v2018_v0 }
  0xcf   : > { %v283_v7 = vpop.permute.xlu0 %282 }
  0xd0   : > { %1698 = vmatpush3.bf16.msra.mxu0 %v283_v7  ;;  %v289_v15 = vpop.permute.xlu1 %288 }
  0xd1   : > { %1699 = vmatprep.subr.bf16.mxu0 %v2018_v0 }
  0xd3   : > { %v285_v8 = vpop.permute.xlu0 %284 }
  0xd4   : > { %1700 = vmatpush3.bf16.msra.mxu0 %v285_v8 }
  0xd5   : > { %1713 = vmatprep.subr.bf16.mxu0 %v2018_v0 }
  0xd7   : > { %1702 = vmatmul.mubr.msk.bf16.vlgmr.msra.gmra.mrb[0].mxu0 %vm291_vm1, %v261_v9 }
  0xd8   : > { %1715 = vmatprep.mubr.msk.bf16.mxu0 %vm2019_vm0, %v2018_v0 }
 0x137   : > { %v758_v10 = vpop.f32.mrb[0].mxu1 }
 0x138   : > { %v1711_v11 = vpop.f32.mrb[1].mxu1  ;;  %v759_v14 = vadd.f32 %v1653_v5, %v758_v10 }
 0x139   : > { %v761_v12 = vpop.f32.mrb[2].mxu1 }
 0x13a   : > { %v1712_v13 = vpop.f32.mrb[3].mxu1  ;;  %v764_v19 = vmul.f32 0.35355338, %v759_v14 }
 0x13c   : > { %v765_v23 = vpack.c.bf16 %v764_v19, %v764_v19 }
 0x13e   : > { %v779_v53 = vrot.slane %v765_v23, %v2251_v31 }
 0x1aa   : > { %v329_v16 = vpop.f32.mrb[0].mxu0 }
 0x1ab   : > { %v330_v17 = vadd.f32 %v329_v16, %v289_v15  ;;  %v1703_v18 = vpop.f32.mrb[1].mxu0 }
 0x1ac   : > { %v332_v20 = vpop.f32.mrb[2].mxu0 }
 0x1ad   : > { %v2243_v21 = vpack.c.bf16 %v330_v17, %v330_v17  ;;  %v1704_v22 = vpop.f32.mrb[3].mxu0 }
 0x1af   : > { %339 = vrot.lane.b32.xlu0 %v2243_v21, %s2021_s14  ;;  %337 = vrot.lane.b32.xlu1 %v2243_v21, %s2022_s21  ;;  %v349_v36 = vrot.slane %v2243_v21, %v2251_v31 }
 0x1b3   : > { %767 = vrot.lane.b32.xlu0 %v765_v23, %s2022_s21  ;;  %341 = vrot.lane.b32.xlu1 %v2243_v21, %s2023_s22  ;;  %s2428_s21 = scalar_lea.hbm %s2482_s4, %s1672_s7 }
 0x1b7   : > { %771 = vrot.lane.b32.xlu0 %v765_v23, %s2023_s22  ;;  %769 = vrot.lane.b32.xlu1 %v765_v23, %s2021_s14  ;;  %s1528_s22 = scalar_lea.sflag [#allocation6], %s2205_s6 }
 0x221   : > { %v2253_v33 = vpop.permute.xlu0 %339  ;;  %v2255_v34 = vpop.permute.xlu1 %337 }
 0x222   : > { %v357_v37 = vrot.slane %v2253_v33, %v2251_v31  ;;  %v383_v45 = vrot.slane %v2255_v34, %v2251_v31 }
 0x224   : > { %v358_v38 = vcombine.low %v349_v36, %v357_v37  ;;  %v359_v39 = vcombine.high %v349_v36, %v357_v37 }
 0x225   : > { %v768_v40 = vpop.permute.xlu0 %767  ;;  %v2264_v41 = vpop.permute.xlu1 %341 }
 0x226   : > { %v366_v42 = vrot.slane %v358_v38, %v2258_v35  ;;  %v373_v43 = vrot.slane %v359_v39, %v2258_v35  ;;  %v391_v44 = vrot.slane %v2264_v41, %v2251_v31  ;;  %v813_v49 = vrot.slane %v768_v40, %v2251_v31 }
 0x228   : > { %v374_v47 = vcombine.high %v366_v42, %v2026_v46  ;;  %v375_v48 = vcombine.high %v373_v43, %v2026_v46  ;;  %v392_v50 = vcombine.low %v383_v45, %v391_v44  ;;  %v393_v51 = vcombine.high %v383_v45, %v391_v44 }
 0x229   : > { %v772_v52 = vpop.permute.xlu0 %771  ;;  %v770_v54 = vpop.permute.xlu1 %769  ;;  %v414_v55 = vshrl.u32 %v366_v42, 16  ;;  %v430_v56 = vshrl.u32 %v373_v43, 16 }
 0x22a   : > { %v821_v57 = vrot.slane %v772_v52, %v2251_v31  ;;  %v787_v58 = vrot.slane %v770_v54, %v2251_v31  ;;  %v422_v59 = vshrl.u32 %v374_v47, 16  ;;  %v438_v60 = vshrl.u32 %v375_v48, 16 }
 0x22b   : > { %v400_v61 = vrot.slane %v392_v50, %v2258_v35  ;;  %v407_v62 = vrot.slane %v393_v51, %v2258_v35 }
 0x22c   : > { %v822_v63 = vcombine.low %v813_v49, %v821_v57  ;;  %v823_v1 = vcombine.high %v813_v49, %v821_v57  ;;  %v788_v2 = vcombine.low %v779_v53, %v787_v58  ;;  %v789_v3 = vcombine.high %v779_v53, %v787_v58 }
 0x22d   : > { %v408_v4 = vcombine.high %v400_v61, %v2026_v46  ;;  %v409_v5 = vcombine.high %v407_v62, %v2026_v46  ;;  %v412_v6 = vpack.i.b16 %v400_v61, %v366_v42  ;;  %v415_v7 = vshrl.u32 %v400_v61, 16 }
 0x22e   : > { %v428_v8 = vpack.i.b16 %v407_v62, %v373_v43  ;;  %v431_v9 = vshrl.u32 %v407_v62, 16  ;;  %v830_v10 = vrot.slane %v822_v63, %v2258_v35  ;;  %v837_v11 = vrot.slane %v823_v1, %v2258_v35 }
 0x22f   : > { %v416_v12 = vpack.i.b16 %v415_v7, %v414_v55  ;;  %v420_v13 = vpack.i.b16 %v408_v4, %v374_v47  ;;  %v423_v14 = vshrl.u32 %v408_v4, 16  ;;  %v436_v15 = vpack.i.b16 %v409_v5, %v375_v48 }
 0x230   : > { %v432_v16 = vpack.i.b16 %v431_v9, %v430_v56  ;;  %v439_v17 = vshrl.u32 %v409_v5, 16  ;;  %v442_v18 = vcombine.low %v412_v6, %v428_v8  ;;  %v838_v19 = vcombine.high %v830_v10, %v2026_v46 }
 0x231   : > { %v424_v20 = vpack.i.b16 %v423_v14, %v422_v59  ;;  %v450_v22 = vcombine.low %v420_v13, %v436_v15  ;;  %v839_v23 = vcombine.high %v837_v11, %v2026_v46  ;;  %v845_v29 = vshrl.u32 %v830_v10, 16 }
 0x232   : > { %v440_v24 = vpack.i.b16 %v439_v17, %v438_v60  ;;  %v467_v25 = vcombine.low %v416_v12, %v432_v16  ;;  %v449_v26 = vrot.slane %v442_v18, %v2251_v31  ;;  %v796_v30 = vrot.slane %v788_v2, %v2258_v35 }
 0x233   : > { %v457_v27 = vrot.slane %v450_v22, %v2251_v31  ;;  %v853_v36 = vshrl.u32 %v838_v19, 16  ;;  %v861_v37 = vshrl.u32 %v837_v11, 16  ;;  %v803_v38 = vrot.slane %v789_v3, %v2258_v35 }
 0x234   : > { %v475_v32 = vcombine.low %v424_v20, %v440_v24  ;;  %v869_v40 = vshrl.u32 %v839_v23, 16  ;;  %v804_v42 = vcombine.high %v796_v30, %v2026_v46  ;;  %v844_v43 = vshrl.u32 %v796_v30, 16 }
 0x235   : > { %v458_v39 = vcombine.low %v449_v26, %v457_v27  ;;  %v474_v44 = vrot.slane %v467_v25, %v2251_v31  ;;  %v805_v47 = vcombine.high %v803_v38, %v2026_v46  ;;  %v860_v48 = vshrl.u32 %v803_v38, 16 }
 0x236   : > { %v482_v45 = vrot.slane %v475_v32, %v2251_v31  ;;  %v846_v50 = vpack.i.b16 %v845_v29, %v844_v43  ;;  %v850_v51 = vpack.i.b16 %v838_v19, %v804_v42  ;;  %v852_v52 = vshrl.u32 %v804_v42, 16 }
 0x237   : > { %v465_v49 = vrot.slane %v458_v39, %v2258_v35  ;;  %v862_v54 = vpack.i.b16 %v861_v37, %v860_v48  ;;  %v866_v55 = vpack.i.b16 %v839_v23, %v805_v47  ;;  %v868_v56 = vshrl.u32 %v805_v47, 16  ;;  %v1123_v47 = vld [vmem:[%s255_s13] sm:$0x1] }
 0x238   : > { %v483_v53 = vcombine.low %v474_v44, %v482_v45  ;;  %v842_v57 = vpack.i.b16 %v830_v10, %v796_v30  ;;  %v854_v58 = vpack.i.b16 %v853_v36, %v852_v52  ;;  %v858_v59 = vpack.i.b16 %v837_v11, %v803_v38 }
 0x239   : > { %v466_v60 = vcombine.high %v465_v49, %v2026_v46  ;;  %v870_v62 = vpack.i.b16 %v869_v40, %v868_v56  ;;  %v496_v63 = vshrl.u32 %v465_v49, 16  ;;  %v880_v1 = vcombine.low %v850_v51, %v866_v55 }
 0x23a   : > { %v490_v61 = vrot.slane %v483_v53, %v2258_v35  ;;  %v897_v5 = vcombine.low %v846_v50, %v862_v54  ;;  %v872_v6 = vcombine.low %v842_v57, %v858_v59  ;;  %v1124_v48 = vsub.f32 1.0, %v1123_v47 }
 0x23b   : > { %v905_v7 = vcombine.low %v854_v58, %v870_v62  ;;  %v504_v10 = vshrl.u32 %v466_v60, 16  ;;  %v887_v14 = vrot.slane %v880_v1, %v2251_v31  ;;  %v1129_v50 = vsub.s32 0, %v2248_v28 }
 0x23c   : > { %v491_v2 = vcombine.high %v490_v61, %v2026_v46  ;;  %v494_v3 = vpack.i.b16 %v490_v61, %v465_v49  ;;  %v497_v4 = vshrl.u32 %v490_v61, 16  ;;  %v904_v15 = vrot.slane %v897_v5, %v2251_v31 }
 0x23d   : > { %v912_v11 = vrot.slane %v905_v7, %v2251_v31  ;;  %v879_v16 = vrot.slane %v872_v6, %v2251_v31  ;;  %v1125_v49 = vmul.f32 10000.0, %v1124_v48 }
 0x23e   : > { %v498_v8 = vpack.i.b16 %v497_v4, %v496_v63  ;;  %v502_v9 = vpack.i.b16 %v491_v2, %v466_v60  ;;  %v505_v12 = vshrl.u32 %v491_v2, 16  ;;  %509 = vst.msk [vmem:[#allocation2] sm:$0xf] %vm508_vm2, %v494_v3 }
 0x23f   : > { %v913_v17 = vcombine.low %v904_v15, %v912_v11  ;;  %v888_v18 = vcombine.low %v879_v16, %v887_v14  ;;  %v1130_v51 = vrot.slane %v1125_v49, %v1129_v50 }
 0x240   : > { %v506_v13 = vpack.i.b16 %v505_v12, %v504_v10  ;;  %510 = vst.msk [vmem:[#allocation2 + $0x4] sm:$0xf] %vm508_vm2, %v498_v8  ;;  %511 = vst.msk [vmem:[#allocation2 + $0x8] sm:$0xf] %vm508_vm2, %v502_v9 }
 0x241   : > { %v920_v22 = vrot.slane %v913_v17, %v2258_v35  ;;  %v895_v25 = vrot.slane %v888_v18, %v2258_v35 }
 0x242   : > { %512 = vst.msk [vmem:[#allocation2 + $0xc] sm:$0xf] %vm508_vm2, %v506_v13 }
 0x243   : > { %v926_v26 = vshrl.u32 %v920_v22, 16  ;;  %v924_v29 = vpack.i.b16 %v920_v22, %v895_v25  ;;  %v925_v30 = vshrl.u32 %v895_v25, 16  ;;  %v921_v38 = vcombine.high %v920_v22, %v2026_v46 }
 0x244   : > { %v896_v40 = vcombine.high %v895_v25, %v2026_v46 }
 0x245   : > { %v934_v19 = vld [vmem:[#allocation2] sm:$0xf]  ;;  %v927_v37 = vpack.i.b16 %v926_v26, %v925_v30  ;;  %v932_v42 = vshrl.u32 %v921_v38, 16 }
 0x246   : > { %v943_v20 = vsel %vm938_vm3, %v934_v19, 0  ;;  %v930_v43 = vpack.i.b16 %v921_v38, %v896_v40  ;;  %v931_v44 = vshrl.u32 %v896_v40, 16 }
 0x247   : > { %1714 = vmatpush3.bf16.xpose.msra.mxu0 %v943_v20  ;;  %v935_v23 = vld [vmem:[#allocation2 + $0x4] sm:$0xf]  ;;  %v936_v27 = vld [vmem:[#allocation2 + $0x8] sm:$0xf] }
 0x248   : > { %v989_v24 = vsel %vm938_vm3, %v935_v23, 0  ;;  %1725 = vmatprep.subr.bf16.mxu0 %v2018_v0  ;;  %v1035_v36 = vsel %vm938_vm3, %v936_v27, 0  ;;  %v933_v45 = vpack.i.b16 %v932_v42, %v931_v44 }
 0x249   : > { %1720 = vmatpush3.bf16.xpose.msra.mxu1 %v989_v24  ;;  %v937_v32 = vld [vmem:[#allocation2 + $0xc] sm:$0xf] }
 0x24a   : > { %1731 = vmatprep.subr.bf16.mxu1 %v2018_v0  ;;  %v1081_v39 = vsel %vm938_vm3, %v937_v32, 0 }
 0x24e   : > { %1716 = vmatmul.mubr.msk.bf16.vlgmr.msra.gmra.mrb[4].mxu0 %vm938_vm3, %v924_v29 }
 0x24f   : > { %1726 = vmatpush3.bf16.xpose.msra.mxu0 %v1035_v36  ;;  %1727 = vmatprep.mubr.msk.bf16.mxu0 %vm2019_vm0, %v2018_v0 }
 0x250   : > { %1722 = vmatmul.mubr.msk.bf16.vlgmr.msra.gmra.mrb[4].mxu1 %vm938_vm3, %v927_v37  ;;  %1737 = vmatprep.subr.bf16.mxu0 %v2018_v0 }
 0x251   : > { %1732 = vmatpush3.bf16.xpose.msra.mxu1 %v1081_v39  ;;  %1733 = vmatprep.mubr.msk.bf16.mxu1 %vm2019_vm0, %v2018_v0 }
 0x252   : > { %1743 = vmatprep.subr.bf16.mxu1 %v2018_v0 }
 0x256   : > { %1728 = vmatmul.mubr.msk.bf16.vlgmr.msra.gmra.mrb[8].mxu0 %vm938_vm3, %v930_v43 }
 0x257   : > { %1739 = vmatprep.mubr.msk.bf16.mxu0 %vm2019_vm0, %v2018_v0 }
 0x258   : > { %1734 = vmatmul.mubr.msk.bf16.vlgmr.msra.gmra.mrb[8].mxu1 %vm938_vm3, %v933_v45 }
 0x259   : > { %1745 = vmatprep.mubr.msk.bf16.mxu1 %vm2019_vm0, %v2018_v0 }
 0x321   : > { %v979_v52 = vpop.f32.mrb[4].mxu0 }
 0x322   : > { %v1132_v53 = vsub.f32 %v979_v52, %v1130_v51  ;;  %v1717_v54 = vpop.f32.mrb[5].mxu0 }
 0x323   : > { %v982_v55 = vpop.f32.mrb[6].mxu0  ;;  %v1025_v56 = vpop.f32.mrb[4].mxu1 }
 0x324   : > { %v1133_v57 = vsub.f32 %v1025_v56, %v1130_v51  ;;  %v1718_v58 = vpop.f32.mrb[7].mxu0  ;;  %v1723_v59 = vpop.f32.mrb[5].mxu1  ;;  %v1136_v60 = vsel %vm938_vm3, %v1132_v53, -inf }
 0x325   : > { %v1028_v61 = vpop.f32.mrb[6].mxu1  ;;  %1137 = vmax.xlane.f32.xlu1 %v1136_v60 }
 0x326   : > { %v1724_v62 = vpop.f32.mrb[7].mxu1  ;;  %v1139_v63 = vsel %vm938_vm3, %v1133_v57, -inf }
 0x327   : > { %1140 = vmax.xlane.f32.xlu0 %v1139_v63 }
 0x329   : > { %v1071_v1 = vpop.f32.mrb[8].mxu0 }
 0x32a   : > { %v1134_v2 = vsub.f32 %v1071_v1, %v1130_v51  ;;  %v1729_v28 = vpop.f32.mrb[9].mxu0 }
 0x32b   : > { %v1074_v3 = vpop.f32.mrb[10].mxu0  ;;  %v1117_v4 = vpop.f32.mrb[8].mxu1 }
 0x32c   : > { %v1135_v5 = vsub.f32 %v1117_v4, %v1130_v51  ;;  %v1730_v6 = vpop.f32.mrb[11].mxu0  ;;  %v1735_v7 = vpop.f32.mrb[9].mxu1  ;;  %v1142_v8 = vsel %vm938_vm3, %v1134_v2, -inf }
 0x32d   : > { %v1120_v9 = vpop.f32.mrb[10].mxu1  ;;  %1143 = vmax.xlane.f32.xlu0 %v1142_v8 }
 0x32e   : > { %v1736_v10 = vpop.f32.mrb[11].mxu1  ;;  %v1145_v12 = vsel %vm938_vm3, %v1135_v5, -inf }
 0x32f   : > { %1146 = vmax.xlane.f32.xlu1 %v1145_v12 }
 0x340   : > { %515 = vrot.lane.b32.xlu1 %v2255_v34, %s2020_s25 }
 0x343   : > { %513 = vrot.lane.b32.xlu0 %v2243_v21, %s2020_s25 }
 0x344   : > { %517 = vrot.lane.b32.xlu1 %v2253_v33, %s2020_s25 }
 0x347   : > { %519 = vrot.lane.b32.xlu0 %v2264_v41, %s2020_s25  ;;  %s252_s25 = scalar_lea.vmem [#allocation9], %s1652_s11 }
 0x348   : > { %s1542_s23 = sshll.u32 %s252_s25, 4  ;;  %s2430_s23 = int_to_ptr.vmem [resolvable:$true] %s1542_s23 }
 0x349   : > { %s1926_s18 = scalar_lea.vmem %s2430_s23, 128  ;;  %p1933_p11 = scmp.lt.s32.totalorder %s2430_s23, %s1931_s12 }
 0x34a   : > { %p1927_p6 = scmp.ne.s32.totalorder %s2430_s23, %s1926_s18  ;;  %p1934_p0 = scmp.lt.s32.totalorder %s1932_s29, %s1926_s18 }
 0x34c   : > { %p1928_p8 = pnand %p1927_p6, %p2152_p10  ;;  %p1935_p5 = por %p1934_p0, %p1933_p11 }
 0x34e   : > { %p1929_p12 = pneg %p1928_p8 }
 0x350   : > { %p1936_p9 = pnand %p1935_p5, %p1929_p12 }
 0x3b2   : > { %v1138_v11 = vpop.xlane.xlu1 %1137 }
 0x3b3   : > { %v1148_v13 = vsub.f32 %v1132_v53, %v1138_v11 }
 0x3b4   : > { %v1141_v14 = vpop.xlane.xlu0 %1140 }
 0x3b5   : > { %v1152_v15 = vmul.f32 1.442695, %v1148_v13  ;;  %v1149_v16 = vsub.f32 %v1133_v57, %v1141_v14 }
 0x3b7   : > { %1852 = vpow2.f32 %v1152_v15  ;;  %v1154_v17 = vmul.f32 1.442695, %v1149_v16 }
 0x3b9   : > { %1854 = vpow2.f32 %v1154_v17 }
 0x3ba   : > { %v1144_v18 = vpop.xlane.xlu0 %1143 }
 0x3bb   : > { %v1150_v19 = vsub.f32 %v1134_v2, %v1144_v18 }
 0x3bc   : > { %v1147_v34 = vpop.xlane.xlu1 %1146 }
 0x3bd   : > { %v1156_v20 = vmul.f32 1.442695, %v1150_v19  ;;  %v1151_v22 = vsub.f32 %v1135_v5, %v1147_v34 }
 0x3be   : > { %v514_v21 = vpop.permute.xlu0 %513 }
 0x3bf   : > { %1856 = vpow2.f32 %v1156_v20  ;;  %v1158_v23 = vmul.f32 1.442695, %v1151_v22  ;;  %v528_v36 = vrot.slane %v514_v21, %v2251_v31 }
 0x3c0   : > { %v516_v33 = vpop.permute.xlu1 %515 }
 0x3c1   : > { %v2348_v24 = vpop.eup %1852  ;;  %1858 = vpow2.f32 %v1158_v23  ;;  %v562_v27 = vrot.slane %v516_v33, %v2251_v31 }
 0x3c2   : > { %v520_v41 = vpop.permute.xlu0 %519  ;;  %v1160_v25 = vsel %vm938_vm3, %v2348_v24, 0.0 }
 0x3c3   : > { %v2352_v26 = vpop.eup %1854  ;;  %v570_v29 = vrot.slane %v520_v41, %v2251_v31  ;;  %1161 = vadd.xlane.f32.xlu1 %v1160_v25 }
 0x3c4   : > { %v518_v30 = vpop.permute.xlu1 %517  ;;  %v1163_v32 = vsel %vm938_vm3, %v2352_v26, 0.0 }
 0x3c5   : > { %v571_v37 = vcombine.low %v562_v27, %v570_v29  ;;  %v572_v38 = vcombine.high %v562_v27, %v570_v29  ;;  %v536_v39 = vrot.slane %v518_v30, %v2251_v31  ;;  %1164 = vadd.xlane.f32.xlu0 %v1163_v32 }
 0x3c7   : > { %v579_v40 = vrot.slane %v571_v37, %v2258_v35  ;;  %v586_v42 = vrot.slane %v572_v38, %v2258_v35  ;;  %v537_v43 = vcombine.low %v528_v36, %v536_v39  ;;  %v538_v44 = vcombine.high %v528_v36, %v536_v39 }
 0x3c9   : > { %v2362_v45 = vpop.eup %1856  ;;  %v587_v47 = vcombine.high %v579_v40, %v2026_v46  ;;  %v545_v48 = vrot.slane %v537_v43, %v2258_v35  ;;  %v552_v49 = vrot.slane %v538_v44, %v2258_v35  ;;  %v588_v52 = vcombine.high %v586_v42, %v2026_v46 }
 0x3ca   : > { %v1166_v50 = vsel %vm938_vm3, %v2362_v45, 0.0  ;;  %v594_v53 = vshrl.u32 %v579_v40, 16  ;;  %v610_v54 = vshrl.u32 %v586_v42, 16 }
 0x3cb   : > { %v2369_v51 = vpop.eup %1858  ;;  %1167 = vadd.xlane.f32.xlu0 %v1166_v50  ;;  %v553_v55 = vcombine.high %v545_v48, %v2026_v46  ;;  %v554_v56 = vcombine.high %v552_v49, %v2026_v46  ;;  %v591_v57 = vpack.i.b16 %v579_v40, %v545_v48  ;;  %v593_v58 = vshrl.u32 %v545_v48, 16 }
 0x3cc   : > { %v602_v59 = vshrl.u32 %v587_v47, 16  ;;  %v607_v60 = vpack.i.b16 %v586_v42, %v552_v49  ;;  %v609_v61 = vshrl.u32 %v552_v49, 16  ;;  %v1169_v62 = vsel %vm938_vm3, %v2369_v51, 0.0 }
 0x3cd   : > { %v595_v63 = vpack.i.b16 %v594_v53, %v593_v58  ;;  %v599_v1 = vpack.i.b16 %v587_v47, %v553_v55  ;;  %v601_v2 = vshrl.u32 %v553_v55, 16  ;;  %v615_v28 = vpack.i.b16 %v588_v52, %v554_v56  ;;  %1170 = vadd.xlane.f32.xlu1 %v1169_v62 }
 0x3ce   : > { %v618_v3 = vshrl.u32 %v588_v52, 16  ;;  %v611_v4 = vpack.i.b16 %v610_v54, %v609_v61  ;;  %v617_v5 = vshrl.u32 %v554_v56, 16  ;;  %v621_v6 = vcombine.low %v591_v57, %v607_v60 }
 0x3cf   : > { %v603_v7 = vpack.i.b16 %v602_v59, %v601_v2  ;;  %v629_v8 = vcombine.low %v599_v1, %v615_v28 }
 0x3d0   : > { %v619_v9 = vpack.i.b16 %v618_v3, %v617_v5  ;;  %v646_v10 = vcombine.low %v595_v63, %v611_v4  ;;  %v628_v12 = vrot.slane %v621_v6, %v2251_v31 }
 0x3d1   : > { %v636_v11 = vrot.slane %v629_v8, %v2251_v31 }
 0x3d2   : > { %v654_v13 = vcombine.low %v603_v7, %v619_v9  ;;  %v653_v15 = vrot.slane %v646_v10, %v2251_v31 }
 0x3d3   : > { %v637_v14 = vcombine.low %v628_v12, %v636_v11 }
 0x3d4   : > { %v661_v16 = vrot.slane %v654_v13, %v2251_v31 }
 0x3d5   : > { %v644_v17 = vrot.slane %v637_v14, %v2258_v35 }
 0x3d6   : > { %v662_v18 = vcombine.low %v653_v15, %v661_v16 }
 0x3d7   : > { %v645_v19 = vcombine.high %v644_v17, %v2026_v46  ;;  %v675_v21 = vshrl.u32 %v644_v17, 16 }
 0x3d8   : > { %v669_v34 = vrot.slane %v662_v18, %v2258_v35 }
 0x3d9   : > { %v683_v25 = vshrl.u32 %v645_v19, 16 }
 0x3da   : > { %v670_v20 = vcombine.high %v669_v34, %v2026_v46  ;;  %v673_v22 = vpack.i.b16 %v669_v34, %v644_v17  ;;  %v676_v23 = vshrl.u32 %v669_v34, 16 }
 0x3dc   : > { %v677_v33 = vpack.i.b16 %v676_v23, %v675_v21  ;;  %v681_v41 = vpack.i.b16 %v670_v20, %v645_v19  ;;  %v684_v27 = vshrl.u32 %v670_v20, 16  ;;  %687 = vst.msk [vmem:[#allocation3] sm:$0xf] %vm508_vm2, %v673_v22 }
 0x3de   : > { %v685_v29 = vpack.i.b16 %v684_v27, %v683_v25  ;;  %688 = vst.msk [vmem:[#allocation3 + $0x4] sm:$0xf] %vm508_vm2, %v677_v33  ;;  %689 = vst.msk [vmem:[#allocation3 + $0x8] sm:$0xf] %vm508_vm2, %v681_v41 }
 0x3e0   : > { %690 = vst.msk [vmem:[#allocation3 + $0xc] sm:$0xf] %vm508_vm2, %v685_v29 }
 0x3e3   : > { %v1184_v30 = vld [vmem:[#allocation3] sm:$0xf] }
 0x3e4   : > { %v1193_v46 = vsel %vm1191_vm4, %v1184_v30, 0 }
 0x3e5   : > { %1738 = vmatpush3.bf16.msra.mxu0 %v1193_v46  ;;  %v1185_v32 = vld [vmem:[#allocation3 + $0x4] sm:$0xf]  ;;  %v1186_v47 = vld [vmem:[#allocation3 + $0x8] sm:$0xf] }
 0x3e6   : > { %v1239_v36 = vsel %vm1191_vm4, %v1185_v32, 0  ;;  %1749 = vmatprep.subr.bf16.mxu0 %v2018_v0  ;;  %v1285_v52 = vsel %vm1191_vm4, %v1186_v47, 0 }
 0x3e7   : > { %1744 = vmatpush3.bf16.msra.mxu1 %v1239_v36  ;;  %v1187_v50 = vld [vmem:[#allocation3 + $0xc] sm:$0xf] }
 0x3e8   : > { %1755 = vmatprep.subr.bf16.mxu1 %v2018_v0 }
 0x450   : > { %v1162_v37 = vpop.xlane.xlu1 %1161 }
 0x451   : > { %1860 = vrcp.f32 %v1162_v37 }
 0x452   : > { %v1165_v38 = vpop.xlane.xlu0 %1164 }
 0x453   : > { %1862 = vrcp.f32 %v1165_v38 }
 0x458   : > { %v1168_v39 = vpop.xlane.xlu0 %1167 }
 0x459   : > { %1864 = vrcp.f32 %v1168_v39 }
 0x45a   : > { %v1171_v42 = vpop.xlane.xlu1 %1170 }
 0x45b   : > { %v1861_v40 = vpop.eup %1860  ;;  %1866 = vrcp.f32 %v1171_v42 }
 0x45c   : > { %v1176_v43 = vmul.f32 %v1861_v40, %v2348_v24  ;;  %v1331_v24 = vsel %vm1191_vm4, %v1187_v50, 0 }
 0x45d   : > { %v1863_v44 = vpop.eup %1862 }
 0x45e   : > { %v1177_v48 = vmul.f32 %v1863_v44, %v2352_v26  ;;  %v1180_v49 = vpack.c.bf16 %v1176_v43, %v1176_v43 }
 0x460   : > { %1740 = vmatmul.mubr.msk.bf16.vlgmr.msra.gmra.mrb[12].mxu0 %vm938_vm3, %v1180_v49  ;;  %v1181_v53 = vpack.c.bf16 %v1177_v48, %v1177_v48 }
 0x461   : > { %1750 = vmatpush3.bf16.msra.mxu0 %v1285_v52  ;;  %1751 = vmatprep.mubr.msk.bf16.mxu0 %vm2019_vm0, %v2018_v0 }
 0x462   : > { %1746 = vmatmul.mubr.msk.bf16.vlgmr.msra.gmra.mrb[12].mxu1 %vm938_vm3, %v1181_v53 }
 0x463   : > { %v1865_v54 = vpop.eup %1864  ;;  %1756 = vmatpush3.bf16.msra.mxu1 %v1331_v24  ;;  %1757 = vmatprep.mubr.msk.bf16.mxu1 %vm2019_vm0, %v2018_v0 }
 0x464   : > { %v1178_v26 = vmul.f32 %v1865_v54, %v2362_v45 }
 0x465   : > { %v1867_v55 = vpop.eup %1866 }
 0x466   : > { %v1182_v56 = vpack.c.bf16 %v1178_v26, %v1178_v26  ;;  %v1179_v57 = vmul.f32 %v1867_v55, %v2369_v51 }
 0x468   : > { %1752 = vmatmul.mubr.msk.bf16.vlgmr.msra.gmra.mrb[16].mxu0 %vm938_vm3, %v1182_v56  ;;  %v1183_v58 = vpack.c.bf16 %v1179_v57, %v1179_v57 }
 0x46a   : > { %1758 = vmatmul.mubr.msk.bf16.vlgmr.msra.gmra.mrb[16].mxu1 %vm938_vm3, %v1183_v58 }
 0x533   : > { %v1229_v59 = vpop.f32.mrb[12].mxu0 }
 0x534   : > { %v1741_v60 = vpop.f32.mrb[13].mxu0 }
 0x535   : > { %v1232_v61 = vpop.f32.mrb[14].mxu0  ;;  %v1275_v62 = vpop.f32.mrb[12].mxu1 }
 0x536   : > { %v1742_v63 = vpop.f32.mrb[15].mxu0  ;;  %v1747_v1 = vpop.f32.mrb[13].mxu1 }
 0x537   : > { %v1278_v2 = vpop.f32.mrb[14].mxu1 }
 0x538   : > { %v1748_v28 = vpop.f32.mrb[15].mxu1 }
 0x53b   : > { %v1321_v0 = vpop.f32.mrb[16].mxu0 }
 0x53c   : > { %v1373_v3 = vcombine.low %v1229_v59, %v1321_v0  ;;  %v1374_v45 = vcombine.high %v1229_v59, %v1321_v0  ;;  %v1753_v4 = vpop.f32.mrb[17].mxu0 }
 0x53d   : > { %v1324_v5 = vpop.f32.mrb[18].mxu0  ;;  %v1367_v6 = vpop.f32.mrb[16].mxu1 }
 0x53e   : > { %v1754_v51 = vpop.f32.mrb[19].mxu0  ;;  %v1389_v7 = vcombine.low %v1275_v62, %v1367_v6  ;;  %v1390_v8 = vcombine.high %v1275_v62, %v1367_v6  ;;  %v1759_v9 = vpop.f32.mrb[17].mxu1  ;;  %v1381_v12 = vrot.slane %v1373_v3, %v2251_v31  ;;  %v1388_v11 = vrot.slane %v1374_v45, %v2251_v31 }
 0x53f   : > { %v1370_v10 = vpop.f32.mrb[18].mxu1 }
 0x540   : > { %v1397_v13 = vrot.slane %v1389_v7, %v2251_v31  ;;  %v1404_v14 = vrot.slane %v1390_v8, %v2251_v31  ;;  %v1760_v15 = vpop.f32.mrb[19].mxu1 }
 0x542   : > { %v1405_v16 = vcombine.low %v1381_v12, %v1397_v13  ;;  %v1406_v17 = vcombine.high %v1381_v12, %v1397_v13  ;;  %v1421_v18 = vcombine.low %v1388_v11, %v1404_v14  ;;  %v1422_v19 = vcombine.high %v1388_v11, %v1404_v14 }
 0x544   : > { %v1413_v34 = vrot.slane %v1405_v16, %v2258_v35  ;;  %v1420_v20 = vrot.slane %v1406_v17, %v2258_v35  ;;  %v1429_v22 = vrot.slane %v1421_v18, %v2258_v35  ;;  %v1436_v21 = vrot.slane %v1422_v19, %v2258_v35 }
 0x546   : > { %v1441_v23 = vcombine.low %v1413_v34, %v1420_v20  ;;  %v1669_v33 = vcombine.high %v1413_v34, %v1420_v20  ;;  %v1457_v41 = vcombine.low %v1429_v22, %v1436_v21  ;;  %v1670_v25 = vcombine.high %v1429_v22, %v1436_v21 }
 0x548   : > { %v1448_v27 = vrot.slane %v1441_v23, %v2251_v31  ;;  %v1456_v29 = vrot.slane %v1669_v33, %v2251_v31  ;;  %v1464_v30 = vrot.slane %v1457_v41, %v2251_v31  ;;  %v1472_v46 = vrot.slane %v1670_v25, %v2251_v31 }
 0x54a   : > { %v1474_v32 = vcombine.high %v1448_v27, %v1456_v29  ;;  %v1490_v36 = vcombine.high %v1464_v30, %v1472_v46  ;;  %v1473_v37 = vcombine.low %v1448_v27, %v1456_v29  ;;  %v1489_v38 = vcombine.low %v1464_v30, %v1472_v46 }
 0x54c   : > { %v1488_v39 = vrot.slane %v1474_v32, %v2258_v35  ;;  %v1504_v40 = vrot.slane %v1490_v36, %v2258_v35  ;;  %v1481_v42 = vrot.slane %v1473_v37, %v2258_v35  ;;  %v1497_v43 = vrot.slane %v1489_v38, %v2258_v35 }
 0x54e   : > { %v1507_v44 = vcombine.low %v1488_v39, %v1504_v40  ;;  %v1506_v47 = vcombine.high %v1481_v42, %v1497_v43  ;;  %v1508_v48 = vcombine.high %v1488_v39, %v1504_v40  ;;  %v1505_v49 = vcombine.low %v1481_v42, %v1497_v43 }
 0x550   : > { %1514 = vrot.lane.b32.xlu1 %v1507_v44, %s2027_s24  ;;  %1510 = vrot.lane.b32.xlu0 %v1506_v47, %s2028_s30 }
 0x554   : > { %1518 = vrot.lane.b32.xlu1 %v1508_v48, %s2029_s9 }
 0x5c2   : > { %v1515_v31 = vpop.permute.xlu1 %1514  ;;  %v1511_v50 = vpop.permute.xlu0 %1510 }
 0x5c3   : > { %v1521_v52 = vsel %vm938_vm3, %v1505_v49, %v1511_v50 }
 0x5c4   : > { %v1523_v53 = vsel %vm1522_vm5, %v1521_v52, %v1515_v31 }
 0x5c6   : > { %v1519_v35 = vpop.permute.xlu1 %1518 }
 0x5c7   : > { %v1525_v24 = vsel %vm1524_vm6, %v1523_v53, %v1519_v35 }
 0x5c8   : > { %1526 = vst.msk [vmem:[%s252_s25] sm:$0xff] %vm291_vm1, %v1525_v24 }
 0x5c9   : > { %1939 = shalt.err (!%p1936_p9)
}
 0x5ca   : > { %s1940_s6 = scalar_lea.hbm %s2428_s21, 128  ;;  %s1944_s30 = scalar_lea.hbm %s2482_s4, 256 }
 0x5cb   : > { %p1941_p1 = scmp.ne.s32.totalorder %s2428_s21, %s1940_s6  ;;  %p1945_p3 = scmp.lt.u32.totalorder %s2428_s21, %s2482_s4 }
 0x5cc   : > { %p1946_p13 = scmp.lt.u32.totalorder %s1944_s30, %s1940_s6  ;;  %p1948_p6 = scmp.lt.u32.totalorder %s1940_s6, %s2428_s21 }
 0x5cd   : > { %p1942_p2 = pnand %p1941_p1, %p2152_p10 }
 0x5ce   : > { %p1947_p4 = por %p1946_p13, %p1945_p3 }
 0x5cf   : > { %p1943_p7 = pneg %p1942_p2 }
 0x5d0   : > { %p1949_p8 = por %p1948_p6, %p1947_p4 }
 0x5d2   : > { %p1950_p12 = pnand %p1949_p8, %p1943_p7 }
 0x5d4   : > { %1953 = shalt.err (!%p1950_p12)
}
 0x5d5   : > { %1767 = dma.vmem_to_hbm [thread:$0]  (%p2152_p10), %s2430_s23, 128, %s2428_s21, %s1528_s22  }
 0x5d6 PF: > { %s1554_s7 = sand.u32 1, %s1992_s15   ;;  %p2500_p11 = scmp.ne.s32.totalorder %s2490_s26, 0 }
 0x5d7   : > { %p2501_p0 = scmp.ge.s32.totalorder %s2012_s20, 2  ;;  %s1555_s25 = scalar_lea.sflag [#allocation6], %s1554_s7 }
 0x5d9   : > { %p1778_p5 = pnand %p2501_p0, %p2500_p11 }
 0x5db   : > { %1987 = dma.done.wait (!%p1778_p5), %s1555_s25, 128  }
 0x5dc   : > { %1989 = vsyncadd (!%p1778_p5), %s1555_s25, 4294967168  ;;  %s21_s20 = sadd.s32 1, %s2012_s20   ;;  %s2502_s15 = smov %s1996_s16 }
 0x5dd   : > { %p18_p9 = scmp.ge.s32.totalorder %s21_s20, 4   ;;  %s2503_s16 = smov %s2000_s17 }
 0x5de   : > { %s2504_s17 = smov %s2161_s10  ;;  %s2505_s18 = smov %s2008_s19 }
 0x5df   : > { %s2506_s19 = smov %s2508_s5  ;;  %20 = sbr.rel (!%p18_p9) target bundleno = 7 (0x7), region = 93 }
 0x5e6   :  { %1560 = vsyncpa [#allocation5], 1 }
 0x5e7   :  { %1562 = vsyncpa [#allocation5 + $0x1], 1 }
 0x5e8   :  { %1563 = vsyncpa [#allocation8], 1 }
 0x5e9   :  { %1564 = vsyncpa [#allocation6], 1 }
 0x5ea   :  { %1566 = vsyncpa [#allocation6 + $0x1], 1 }

</bundles_post_ra>
